<compile_context>
chip_gen: v7x
topology: tpu7x:2x2x1
jax: 0.10.0
libtpu: 0.0.40
codegen_flags: <defaults>
</compile_context>

<pallas_src>
from collections import OrderedDict

import jax
import jax.numpy as jnp
from jax import lax
from jax.experimental import pallas as pl
from jax.experimental.pallas import tpu as pltpu

NAMES = {
    'vgg11': ['conv1_1', 'relu1_1', 'pool1', 'conv2_1', 'relu2_1', 'pool2',
              'conv3_1', 'relu3_1', 'conv3_2', 'relu3_2', 'pool3',
              'conv4_1', 'relu4_1', 'conv4_2', 'relu4_2', 'pool4',
              'conv5_1', 'relu5_1', 'conv5_2', 'relu5_2', 'pool5'],
    'vgg13': ['conv1_1', 'relu1_1', 'conv1_2', 'relu1_2', 'pool1',
              'conv2_1', 'relu2_1', 'conv2_2', 'relu2_2', 'pool2',
              'conv3_1', 'relu3_1', 'conv3_2', 'relu3_2', 'pool3',
              'conv4_1', 'relu4_1', 'conv4_2', 'relu4_2', 'pool4',
              'conv5_1', 'relu5_1', 'conv5_2', 'relu5_2', 'pool5'],
    'vgg16': ['conv1_1', 'relu1_1', 'conv1_2', 'relu1_2', 'pool1',
              'conv2_1', 'relu2_1', 'conv2_2', 'relu2_2', 'pool2',
              'conv3_1', 'relu3_1', 'conv3_2', 'relu3_2', 'conv3_3', 'relu3_3', 'pool3',
              'conv4_1', 'relu4_1', 'conv4_2', 'relu4_2', 'conv4_3', 'relu4_3', 'pool4',
              'conv5_1', 'relu5_1', 'conv5_2', 'relu5_2', 'conv5_3', 'relu5_3', 'pool5'],
    'vgg19': ['conv1_1', 'relu1_1', 'conv1_2', 'relu1_2', 'pool1',
              'conv2_1', 'relu2_1', 'conv2_2', 'relu2_2', 'pool2',
              'conv3_1', 'relu3_1', 'conv3_2', 'relu3_2', 'conv3_3', 'relu3_3',
              'conv3_4', 'relu3_4', 'pool3',
              'conv4_1', 'relu4_1', 'conv4_2', 'relu4_2', 'conv4_3', 'relu4_3',
              'conv4_4', 'relu4_4', 'pool4',
              'conv5_1', 'relu5_1', 'conv5_2', 'relu5_2', 'conv5_3', 'relu5_3',
              'conv5_4', 'relu5_4', 'pool5'],
}

# out-channel count per VGG stage (standard torchvision configs)
_VGG_STAGE_OUT = {1: 64, 2: 128, 3: 256, 4: 512, 5: 512}

# target per-tile working-set size (bytes) used to choose the row tile
_DEFAULT_ROW_BUDGET = 8 * 1024 * 1024


def insert_bn(names):
    names_bn = []
    for name in names:
        names_bn.append(name)
        if 'conv' in name:
            names_bn.append('bn' + name.replace('conv', ''))
    return names_bn


# ----------------------------------------------------------------------------
# tiling helpers
# ----------------------------------------------------------------------------
def _largest_divisor_leq(n, cap):
    cap = max(1, min(n, int(cap)))
    for d in range(cap, 0, -1):
        if n % d == 0:
            return d
    return 1


def _pick_conv_row_tile(H_out, W, Cin, TCout, pooled, im2col, budget):
    """Largest divisor of H_out whose per-tile working set fits `budget`."""
    Wp = W + 2
    Kw = (9 if im2col else 3) * Cin
    Wp_out = (W // 2 + 2) if pooled else Wp
    best = 1
    for d in range(1, H_out + 1):
        if H_out % d:
            continue
        rows_conv = 2 * d if pooled else d
        rows_in = rows_conv + 2
        est = (3 * rows_in * Wp * Cin * 2        # input slab: 2 pipeline bufs + concat copy
               + rows_conv * W * Kw * 2          # kw-merged patch (transient, bf16)
               + rows_conv * W * TCout * 4       # f32 accumulator
               + 2 * d * Wp_out * TCout * 2)     # output block, double-buffered
        if est <= budget:
            best = d
    return best


# ----------------------------------------------------------------------------
# Pallas kernels
# ----------------------------------------------------------------------------
def _make_conv_kernel(T_out, W, Cin, TCout, do_relu, do_pool, im2col, n_h, h_axis):
    """3x3/stride-1 conv on a row tile of a W-halo-padded bf16 NHWC tensor.

    Taps are merged into the matmul K dimension (im2col: K=9*Cin single
    matmul; Cin<=128: K=3*Cin per kh; else 9 full-depth K=Cin matmuls),
    f32 accumulation in a local value, fused bias (+ReLU) (+2x2 max-pool),
    W-halo columns zeroed on write.  The H halo is synthesized in-kernel for
    the first/last row tiles."""
    rows_conv = 2 * T_out if do_pool else T_out
    Wo = W // 2 if do_pool else W
    merge_kw = (not im2col) and (Cin <= 128)

    def kernel(top_ref, main_ref, bot_ref, w_ref, b_ref, o_ref):
        # top_ref/bot_ref : (1, 1, W+2, Cin)          bf16  (row above / below tile)
        # main_ref        : (1, rows_conv, W+2, Cin)  bf16
        # w_ref           : (ng, Kg, TCout)           bf16
        # b_ref           : (1, TCout)                f32
        # o_ref           : (1, T_out, Wo+2, TCout)   bf16
        top = top_ref[0]
        bot = bot_ref[0]
        if n_h == 1:
            top = jnp.zeros_like(top)
            bot = jnp.zeros_like(bot)
        else:
            h = pl.program_id(h_axis)
            top = jnp.where(h == 0, jnp.zeros_like(top), top)
            bot = jnp.where(h == n_h - 1, jnp.zeros_like(bot), bot)
        slab = jnp.concatenate([top, main_ref[0], bot], axis=0)  # (rows_conv+2, W+2, Cin)

        acc = None
        if im2col:
            taps = [slab[kh:kh + rows_conv, kw:kw + W, :]
                    for kh in range(3) for kw in range(3)]
            patch = jnp.concatenate(taps, axis=-1).reshape(rows_conv * W, 9 * Cin)
            acc = jnp.dot(patch, w_ref[0], preferred_element_type=jnp.float32)
        elif merge_kw:
            for kh in range(3):
                taps = [slab[kh:kh + rows_conv, kw:kw + W, :] for kw in range(3)]
                patch = jnp.concatenate(taps, axis=-1).reshape(rows_conv * W, 3 * Cin)
                part = jnp.dot(patch, w_ref[kh],
                               preferred_element_type=jnp.float32)
                acc = part if acc is None else acc + part
        else:
            # Cin >= 256: already full MXU depth, avoid the concat copies
            for kh in range(3):
                for kw in range(3):
                    patch = slab[kh:kh + rows_conv, kw:kw + W, :].reshape(
                        rows_conv * W, Cin)
                    part = jnp.dot(patch, w_ref[kh, kw * Cin:(kw + 1) * Cin, :],
                                   preferred_element_type=jnp.float32)
                    acc = part if acc is None else acc + part

        res = acc + b_ref[...]                      # (rows_conv*W, TCout) + (1, TCout)
        if do_relu:
            res = jnp.maximum(res, 0.0)
        res = res.reshape(rows_conv, W, TCout)
        if do_pool:
            res = jnp.max(res.reshape(rows_conv, Wo, 2, TCout), axis=2)   # pairs along W
            res = jnp.max(res.reshape(T_out, 2, Wo, TCout), axis=1)       # pairs along H
        res = res.astype(o_ref.dtype)

        # zero only the W-halo column strips, store the interior once
        zcol = jnp.zeros((T_out, 1, TCout), o_ref.dtype)
        o_ref[0, :, 0:1, :] = zcol
        o_ref[0, :, Wo + 1:Wo + 2, :] = zcol
        o_ref[0, :, 1:Wo + 1, :] = res

    return kernel


def _relu_kernel(x_ref, o_ref):
    # only used when a conv (pre-ReLU) output is itself a requested target
    o_ref[...] = jnp.maximum(x_ref[...], 0).astype(o_ref.dtype)


def _make_pool_kernel(To, W, TC):
    """2x2/2 max-pool on a row tile of a W-halo-padded NHWC tensor."""
    Wo = W // 2

    def kernel(x_ref, o_ref):
        x = x_ref[0, :, 1:W + 1, :]                          # (2*To, W, TC) interior
        t = jnp.max(x.reshape(2 * To, Wo, 2, TC), axis=2)     # pairs along W
        t = jnp.max(t.reshape(To, 2, Wo, TC), axis=1)         # pairs along H
        zcol = jnp.zeros((To, 1, TC), o_ref.dtype)
        o_ref[0, :, 0:1, :] = zcol
        o_ref[0, :, Wo + 1:Wo + 2, :] = zcol
        o_ref[0, :, 1:Wo + 1, :] = t.astype(o_ref.dtype)

    return kernel


# ----------------------------------------------------------------------------
# Python wrappers around pallas_call (all operate on (B, H, W+2, C) bf16)
# ----------------------------------------------------------------------------
def conv3x3_fused(x, w, b, *, do_relu, do_pool, row_budget=_DEFAULT_ROW_BUDGET):
    # x: (B, H, W+2, Cin) bf16 (zero W halo); w: (ng, Kg, Cout) bf16; b: (1, Cout) f32
    B, H, Wp, Cin = x.shape
    W = Wp - 2
    ng, Kg, Cout = w.shape
    im2col = (ng == 1)
    if do_pool:
        assert H % 2 == 0 and W % 2 == 0, "2x2 max-pool needs even spatial dims"
    H_out = H // 2 if do_pool else H
    W_out = W // 2 if do_pool else W
    Wp_out = W_out + 2

    TCout = Cout if Cout <= 128 else 128          # lane-dense out-channel tiling
    n_co = Cout // TCout

    T_out = _pick_conv_row_tile(H_out, W, Cin, TCout, do_pool, im2col, row_budget)
    n_h = H_out // T_out
    rows_main = 2 * T_out if do_pool else T_out   # input rows per tile (no halo)

    # grid ordering: keep the larger of {weights, activations} resident
    w_bytes = ng * Kg * Cout * 2
    act_bytes = H * Wp * Cin * 2 + H_out * Wp_out * Cout * 2   # per image
    weights_outer = w_bytes > act_bytes

    if weights_outer:
        grid = (n_co, B, n_h)
        h_axis = 2
        x_main_map = lambda co, bi, h: (bi, h, 0, 0)
        x_top_map = lambda co, bi, h: (bi, jnp.maximum(h * rows_main - 1, 0), 0, 0)
        x_bot_map = lambda co, bi, h: (bi, jnp.minimum((h + 1) * rows_main, H - 1), 0, 0)
        w_map = lambda co, bi, h: (0, 0, co)
        b_map = lambda co, bi, h: (0, co)
        o_map = lambda co, bi, h: (bi, h, 0, co)
    else:
        grid = (B, n_h, n_co)
        h_axis = 1
        x_main_map = lambda bi, h, co: (bi, h, 0, 0)
        x_top_map = lambda bi, h, co: (bi, jnp.maximum(h * rows_main - 1, 0), 0, 0)
        x_bot_map = lambda bi, h, co: (bi, jnp.minimum((h + 1) * rows_main, H - 1), 0, 0)
        w_map = lambda bi, h, co: (0, 0, co)
        b_map = lambda bi, h, co: (0, co)
        o_map = lambda bi, h, co: (bi, h, 0, co)

    kernel = _make_conv_kernel(T_out, W, Cin, TCout, do_relu, do_pool,
                               im2col, n_h, h_axis)

    # VMEM limit: per-tile working set (slab copies, patch, f32 acc, output)
    # + double-buffered weight/bias blocks + margin
    rows_conv = rows_main
    est = (3 * (rows_conv + 2) * Wp * Cin * 2
           + rows_conv * W * Kg * 2
           + rows_conv * W * TCout * 4
           + 2 * T_out * Wp_out * TCout * 2
           + 2 * (ng * Kg * TCout * 2 + TCout * 4))
    vmem_limit = int(min(max(32 << 20, 2 * est + (4 << 20)), 48 << 20))

    return pl.pallas_call(
        kernel,
        out_shape=jax.ShapeDtypeStruct((B, H_out, Wp_out, Cout), jnp.bfloat16),
        grid=grid,
        in_specs=[
            pl.BlockSpec((1, 1, Wp, Cin), x_top_map),
            pl.BlockSpec((1, rows_main, Wp, Cin), x_main_map),
            pl.BlockSpec((1, 1, Wp, Cin), x_bot_map),
            pl.BlockSpec((ng, Kg, TCout), w_map),
            pl.BlockSpec((1, TCout), b_map),
        ],
        out_specs=pl.BlockSpec((1, T_out, Wp_out, TCout), o_map),
        compiler_params=pltpu.CompilerParams(
            dimension_semantics=("parallel", "parallel", "parallel"),
            vmem_limit_bytes=vmem_limit),
    )(x, x, x, w, b)


def relu_act(x, *, row_budget=_DEFAULT_ROW_BUDGET):
    B, H, Wp, C = x.shape
    TC = C if C <= 128 else 128
    per_row = 2 * Wp * TC * 2 * 2
    TH = _largest_divisor_leq(H, max(1, row_budget // per_row))
    return pl.pallas_call(
        _relu_kernel,
        out_shape=jax.ShapeDtypeStruct(x.shape, x.dtype),
        grid=(B, C // TC, H // TH),
        in_specs=[pl.BlockSpec((1, TH, Wp, TC), lambda bi, c, h: (bi, h, 0, c))],
        out_specs=pl.BlockSpec((1, TH, Wp, TC), lambda bi, c, h: (bi, h, 0, c)),
        compiler_params=pltpu.CompilerParams(
            dimension_semantics=("parallel", "parallel", "parallel"),
            vmem_limit_bytes=32 << 20),
    )(x)


def maxpool2x2(x, *, row_budget=_DEFAULT_ROW_BUDGET):
    B, H, Wp, C = x.shape
    W = Wp - 2
    assert H % 2 == 0 and W % 2 == 0, "2x2 max-pool needs even spatial dims"
    Ho, Wo = H // 2, W // 2
    TC = C if C <= 128 else 128
    per_out_row = (2 * Wp + (Wo + 2)) * TC * 2 * 2
    To = _largest_divisor_leq(Ho, max(1, row_budget // per_out_row))
    kernel = _make_pool_kernel(To, W, TC)
    return pl.pallas_call(
        kernel,
        out_shape=jax.ShapeDtypeStruct((B, Ho, Wo + 2, C), x.dtype),
        grid=(B, C // TC, Ho // To),
        in_specs=[pl.BlockSpec((1, 2 * To, Wp, TC), lambda bi, c, h: (bi, h, 0, c))],
        out_specs=pl.BlockSpec((1, To, Wo + 2, TC), lambda bi, c, h: (bi, h, 0, c)),
        compiler_params=pltpu.CompilerParams(
            dimension_semantics=("parallel", "parallel", "parallel"),
            vmem_limit_bytes=32 << 20),
    )(x)


def _to_nchw(x_padded):
    # (B, H, W+2, C) bf16 -> unpadded f32 NCHW (only for requested targets)
    return jnp.transpose(x_padded[:, :, 1:-1, :].astype(jnp.float32), (0, 3, 1, 2))


# ----------------------------------------------------------------------------
# VGG module (JAX / Pallas)
# ----------------------------------------------------------------------------
class VGGPallas:
    """Pallas re-implementation of the PyTorch `VGG` feature extractor.

    Weights are synthetic and deterministic (He-normal-ish), NOT pretrained.
    """

    def __init__(self, model_type: str = 'vgg11', seed: int = 0,
                 row_budget_bytes: int = _DEFAULT_ROW_BUDGET):
        # TODO(synk): '*_bn' variants (BatchNorm layers from insert_bn) are not implemented.
        assert 'bn' not in model_type, "BatchNorm VGG variants not supported in this kernel."
        self.names = list(NAMES[model_type])
        self.row_budget = int(row_budget_bytes)

        self.vgg_mean = jnp.array([0.485, 0.456, 0.406], jnp.float32)
        self.vgg_std = jnp.array([0.229, 0.224, 0.225], jnp.float32)

        key = jax.random.PRNGKey(seed)
        self.params = {}       # kernel params: ((ng, Kg, Cout) bf16 weights, (1, Cout) f32 bias)
        self.params_f32 = {}   # raw f32 HWIO params (reference / testing)
        cin = 3
        idx = 0
        for name in self.names:
            if name.startswith('conv'):
                stage = int(name[4])
                cout = _VGG_STAGE_OUT[stage]
                k = jax.random.fold_in(key, idx)
                idx += 1
                kw_key, kb_key = jax.random.split(k)
                fan_in = cin * 9
                w = (jax.random.normal(kw_key, (3, 3, cin, cout), jnp.float32)
                     * (2.0 / fan_in) ** 0.5)
                b = jax.random.normal(kb_key, (cout,), jnp.float32) * 0.01
                self.params_f32[name] = (w, b)

                if cin * 9 <= 128:
                    wk = w.reshape(1, 9 * cin, cout)     # full-im2col layout (conv1_1)
                else:
                    wk = w.reshape(3, 3 * cin, cout)     # per-kh, kw-merged layout
                self.params[name] = (wk.astype(jnp.bfloat16),
                                     b.reshape(1, cout).astype(jnp.float32))
                cin = cout

    def __call__(self, x_nchw, targets):
        assert all(t in self.names for t in targets), 'Specified name does not exist.'
        # NOTE: the PyTorch module asserts the input is in [0, 1]; that is a host
        # sync / breaks under jit, so it is intentionally omitted here.

        x = jnp.transpose(x_nchw.astype(jnp.float32), (0, 2, 3, 1))          # NCHW->NHWC
        x = (x - self.vgg_mean.reshape(1, 1, 1, 3)) / self.vgg_std.reshape(1, 1, 1, 3)
        x = jnp.pad(x, ((0, 0), (0, 0), (1, 1), (0, 0)))                      # zero W halo
        x = x.astype(jnp.bfloat16)                                            # bf16 activations
        # TODO(synk): a 2x2 space-to-depth pre-pack of the 3-channel input would make
        #             conv1_1 fully lane-dense; im2col (K=27) is used instead.

        out_dict = OrderedDict()
        n_targets = len(targets)
        names = self.names
        i = 0
        while i < len(names) and len(out_dict) < n_targets:
            name = names[i]
            if name.startswith('conv'):
                w, b = self.params[name]
                nxt = names[i + 1] if i + 1 < len(names) else ''
                nxt2 = names[i + 2] if i + 2 < len(names) else ''
                fuse_relu = nxt.startswith('relu') and (name not in targets)
                fuse_pool = (fuse_relu and nxt2.startswith('pool')
                             and (nxt not in targets))
                x = conv3x3_fused(x, w, b, do_relu=fuse_relu, do_pool=fuse_pool,
                                  row_budget=self.row_budget)
                if name in targets:
                    out_dict[name] = _to_nchw(x)
                if fuse_relu and nxt in targets:
                    out_dict[nxt] = _to_nchw(x)
                if fuse_pool and nxt2 in targets:
                    out_dict[nxt2] = _to_nchw(x)
                i += 1 + int(fuse_relu) + int(fuse_pool)
            elif name.startswith('relu'):
                x = relu_act(x, row_budget=self.row_budget)
                if name in targets:
                    out_dict[name] = _to_nchw(x)
                i += 1
            elif name.startswith('pool'):
                x = maxpool2x2(x, row_budget=self.row_budget)
                if name in targets:
                    out_dict[name] = _to_nchw(x)
                i += 1
            else:
                raise ValueError(f'unknown layer {name}')
        return out_dict

    # pure-JAX/XLA reference of the same forward math (f32), for testing
    def reference(self, x_nchw, targets):
        x = jnp.transpose(x_nchw.astype(jnp.float32), (0, 2, 3, 1))
        x = (x - self.vgg_mean.reshape(1, 1, 1, 3)) / self.vgg_std.reshape(1, 1, 1, 3)
        out = OrderedDict()
        for name in self.names:
            if name.startswith('conv'):
                w, b = self.params_f32[name]
                x = lax.conv_general_dilated(
                    x, w, (1, 1), 'SAME',
                    dimension_numbers=('NHWC', 'HWIO', 'NHWC'))
                x = x + b.reshape(1, 1, 1, -1)
            elif name.startswith('relu'):
                x = jnp.maximum(x, 0.0)
            elif name.startswith('pool'):
                x = lax.reduce_window(x, -jnp.inf, lax.max,
                                      (1, 2, 2, 1), (1, 2, 2, 1), 'VALID')
            if name in targets:
                out[name] = jnp.transpose(x, (0, 3, 1, 2))
            if len(out) == len(targets):
                break
        return out


if __name__ == "__main__":
    key = jax.random.PRNGKey(0)
    # input normalized to [0, 1], NCHW, 3 channels (required by vgg_mean/std)
    x = jax.random.uniform(key, (2, 3, 16, 16), dtype=jnp.float32)

    model = VGGPallas('vgg11', seed=0)
    targets = ['relu1_1', 'pool1', 'relu2_1', 'relu3_1', 'pool3']
    outs = model(x, targets)
    for v in outs.values():
        jax.block_until_ready(v)

    assert outs['relu1_1'].shape == (2, 64, 16, 16)
    assert outs['pool1'].shape == (2, 64, 8, 8)
    assert outs['relu2_1'].shape == (2, 128, 8, 8)
    assert outs['relu3_1'].shape == (2, 256, 4, 4)
    assert outs['pool3'].shape == (2, 256, 2, 2)
    assert bool(jnp.all(outs['relu1_1'] >= 0.0))

    # numerical check vs. pure-JAX f32 reference (kernel uses bf16 activations
    # and bf16 matmul inputs, so tolerances are relative but catch any
    # structural / halo / offset bug)
    refs = model.reference(x, targets)
    for k in targets:
        ref = refs[k]
        got = outs[k]
        err_max = float(jnp.max(jnp.abs(got - ref)))
        err_mean = float(jnp.mean(jnp.abs(got - ref)))
        ref_max = float(jnp.max(jnp.abs(ref)))
        ref_mean = float(jnp.mean(jnp.abs(ref)))
        assert err_max <= 0.12 * ref_max + 0.05, (k, err_max, ref_max)
        assert err_mean <= 0.05 * ref_mean + 0.02, (k, err_mean, ref_mean)

    # exercise the multi-row-tile path (n_h > 1) with a tiny per-tile budget
    # and check it matches the single-tile run.
    model_tiled = VGGPallas('vgg11', seed=0, row_budget_bytes=50 * 1024)
    small_targets = ['relu1_1', 'pool1', 'relu2_1']
    outs_t = model_tiled(x, small_targets)
    for v in outs_t.values():
        jax.block_until_ready(v)
    for k in small_targets:
        d = float(jnp.max(jnp.abs(outs_t[k] - outs[k])))
        assert d <= 2e-2, (k, d)

    print("KERNEL_OK")
</pallas_src>

<mosaic_0001>
module attributes {stable_mosaic.version = 11 : i64} {
  func.func @kernel(%arg0: i32, %arg1: i32, %arg2: i32, %arg3: memref<1x1x18x3xbf16, #tpu.memory_space<vmem>>, %arg4: memref<1x16x18x3xbf16, #tpu.memory_space<vmem>>, %arg5: memref<1x1x18x3xbf16, #tpu.memory_space<vmem>>, %arg6: memref<1x27x64xbf16, #tpu.memory_space<vmem>>, %arg7: memref<1x64xf32, #tpu.memory_space<vmem>>, %arg8: memref<1x16x18x64xbf16, #tpu.memory_space<vmem>>) attributes {dimension_semantics = [#tpu.dimension_semantics<parallel>, #tpu.dimension_semantics<parallel>, #tpu.dimension_semantics<parallel>], iteration_bounds = array<i64: 2, 1, 1>, scalar_prefetch = 0 : i64, scratch_operands = 0 : i64, tpu.core_type = #tpu.core_type<tc>, window_params = [{transform_indices = @transform_0, window_bounds = array<i64: 1, 1, 18, 3>}, {transform_indices = @transform_1, window_bounds = array<i64: 1, 16, 18, 3>}, {transform_indices = @transform_2, window_bounds = array<i64: 1, 1, 18, 3>}, {transform_indices = @transform_3, window_bounds = array<i64: 1, 27, 64>}, {transform_indices = @transform_4, window_bounds = array<i64: 1, 64>}, {transform_indices = @transform_5, window_bounds = array<i64: 1, 16, 18, 64>}]} {
    %cst = arith.constant 0.000000e+00 : bf16
    %0 = vector.broadcast %cst : bf16 to vector<1x18x3xbf16>
    %cst_0 = arith.constant 0.000000e+00 : bf16
    %1 = vector.broadcast %cst_0 : bf16 to vector<1x18x3xbf16>
    %c0 = arith.constant 0 : index
    %c0_1 = arith.constant 0 : index
    %c0_2 = arith.constant 0 : index
    %c0_3 = arith.constant 0 : index
    %2 = vector.load %arg4[%c0, %c0_1, %c0_2, %c0_3] : memref<1x16x18x3xbf16, #tpu.memory_space<vmem>>, vector<1x16x18x3xbf16>
    %3 = vector.shape_cast %2 : vector<1x16x18x3xbf16> to vector<16x18x3xbf16>
    %4 = tpu.concatenate %0, %3, %1 in 0 : vector<1x18x3xbf16>, vector<16x18x3xbf16>, vector<1x18x3xbf16> -> vector<18x18x3xbf16>
    %5 = vector.extract_strided_slice %4 {offsets = [0, 0, 0], sizes = [16, 16, 3], strides = [1, 1, 1]} : vector<18x18x3xbf16> to vector<16x16x3xbf16>
    %6 = vector.extract_strided_slice %4 {offsets = [0, 1, 0], sizes = [16, 16, 3], strides = [1, 1, 1]} : vector<18x18x3xbf16> to vector<16x16x3xbf16>
    %7 = vector.extract_strided_slice %4 {offsets = [0, 2, 0], sizes = [16, 16, 3], strides = [1, 1, 1]} : vector<18x18x3xbf16> to vector<16x16x3xbf16>
    %8 = vector.extract_strided_slice %4 {offsets = [1, 0, 0], sizes = [16, 16, 3], strides = [1, 1, 1]} : vector<18x18x3xbf16> to vector<16x16x3xbf16>
    %9 = vector.extract_strided_slice %4 {offsets = [1, 1, 0], sizes = [16, 16, 3], strides = [1, 1, 1]} : vector<18x18x3xbf16> to vector<16x16x3xbf16>
    %10 = vector.extract_strided_slice %4 {offsets = [1, 2, 0], sizes = [16, 16, 3], strides = [1, 1, 1]} : vector<18x18x3xbf16> to vector<16x16x3xbf16>
    %11 = vector.extract_strided_slice %4 {offsets = [2, 0, 0], sizes = [16, 16, 3], strides = [1, 1, 1]} : vector<18x18x3xbf16> to vector<16x16x3xbf16>
    %12 = vector.extract_strided_slice %4 {offsets = [2, 1, 0], sizes = [16, 16, 3], strides = [1, 1, 1]} : vector<18x18x3xbf16> to vector<16x16x3xbf16>
    %13 = vector.extract_strided_slice %4 {offsets = [2, 2, 0], sizes = [16, 16, 3], strides = [1, 1, 1]} : vector<18x18x3xbf16> to vector<16x16x3xbf16>
    %14 = tpu.concatenate %5, %6, %7, %8, %9, %10, %11, %12, %13 in 2 : vector<16x16x3xbf16>, vector<16x16x3xbf16>, vector<16x16x3xbf16>, vector<16x16x3xbf16>, vector<16x16x3xbf16>, vector<16x16x3xbf16>, vector<16x16x3xbf16>, vector<16x16x3xbf16>, vector<16x16x3xbf16> -> vector<16x16x27xbf16>
    %15 = vector.shape_cast %14 : vector<16x16x27xbf16> to vector<256x27xbf16>
    %c0_4 = arith.constant 0 : index
    %c0_5 = arith.constant 0 : index
    %c0_6 = arith.constant 0 : index
    %16 = vector.load %arg6[%c0_4, %c0_5, %c0_6] : memref<1x27x64xbf16, #tpu.memory_space<vmem>>, vector<1x27x64xbf16>
    %17 = vector.shape_cast %16 : vector<1x27x64xbf16> to vector<27x64xbf16>
    %cst_7 = arith.constant dense<0.000000e+00> : vector<256x64xf32>
    %18 = tpu.matmul %15, %17, %cst_7 {dimension_numbers = #tpu.dot_dimension_numbers<[1], [0], [0], [1], [0, 0, 1, 1], [], []>} : vector<256x27xbf16>, vector<27x64xbf16>, vector<256x64xf32> -> vector<256x64xf32>
    %c0_8 = arith.constant 0 : index
    %c0_9 = arith.constant 0 : index
    %19 = vector.load %arg7[%c0_8, %c0_9] : memref<1x64xf32, #tpu.memory_space<vmem>>, vector<1x64xf32>
    %20 = vector.broadcast %19 : vector<1x64xf32> to vector<256x64xf32>
    %21 = arith.addf %18, %20 : vector<256x64xf32>
    %cst_10 = arith.constant 0.000000e+00 : f32
    %22 = vector.broadcast %cst_10 : f32 to vector<256x64xf32>
    %23 = arith.maximumf %21, %22 : vector<256x64xf32>
    %24 = vector.shape_cast %23 : vector<256x64xf32> to vector<16x16x64xf32>
    %25 = arith.truncf %24 : vector<16x16x64xf32> to vector<16x16x64xbf16>
    %cst_11 = arith.constant 0.000000e+00 : bf16
    %26 = vector.broadcast %cst_11 : bf16 to vector<16x1x64xbf16>
    %c0_12 = arith.constant 0 : index
    %c0_13 = arith.constant 0 : index
    %c0_14 = arith.constant 0 : index
    %c0_15 = arith.constant 0 : index
    %27 = vector.load %arg8[%c0_12, %c0_13, %c0_14, %c0_15] : memref<1x16x18x64xbf16, #tpu.memory_space<vmem>>, vector<1x16x1x64xbf16>
    %28 = vector.shape_cast %27 : vector<1x16x1x64xbf16> to vector<16x1x64xbf16>
    %29 = vector.shape_cast %26 : vector<16x1x64xbf16> to vector<1x16x1x64xbf16>
    tpu.vector_store %arg8[%c0_12, %c0_13, %c0_14, %c0_15], %29 {strides = array<i32>} : memref<1x16x18x64xbf16, #tpu.memory_space<vmem>>, vector<1x16x1x64xbf16>,
    %c0_16 = arith.constant 0 : index
    %c0_17 = arith.constant 0 : index
    %c17 = arith.constant 17 : index
    %c0_18 = arith.constant 0 : index
    %30 = vector.load %arg8[%c0_16, %c0_17, %c17, %c0_18] : memref<1x16x18x64xbf16, #tpu.memory_space<vmem>>, vector<1x16x1x64xbf16>
    %31 = vector.shape_cast %30 : vector<1x16x1x64xbf16> to vector<16x1x64xbf16>
    %32 = vector.shape_cast %26 : vector<16x1x64xbf16> to vector<1x16x1x64xbf16>
    tpu.vector_store %arg8[%c0_16, %c0_17, %c17, %c0_18], %32 {strides = array<i32>} : memref<1x16x18x64xbf16, #tpu.memory_space<vmem>>, vector<1x16x1x64xbf16>,
    %c0_19 = arith.constant 0 : index
    %c0_20 = arith.constant 0 : index
    %c1 = arith.constant 1 : index
    %c0_21 = arith.constant 0 : index
    %33 = vector.load %arg8[%c0_19, %c0_20, %c1, %c0_21] : memref<1x16x18x64xbf16, #tpu.memory_space<vmem>>, vector<1x16x16x64xbf16>
    %34 = vector.shape_cast %33 : vector<1x16x16x64xbf16> to vector<16x16x64xbf16>
    %35 = vector.shape_cast %25 : vector<16x16x64xbf16> to vector<1x16x16x64xbf16>
    tpu.vector_store %arg8[%c0_19, %c0_20, %c1, %c0_21], %35 {strides = array<i32>} : memref<1x16x18x64xbf16, #tpu.memory_space<vmem>>, vector<1x16x16x64xbf16>,
    return
  }
  func.func @transform_0(%arg0: i32, %arg1: i32, %arg2: i32) -> (i32, i32, i32, i32) {
    %c16_i32 = arith.constant 16 : i32
    %0 = arith.muli %arg1, %c16_i32 : i32
    %c1_i32 = arith.constant 1 : i32
    %1 = arith.subi %0, %c1_i32 : i32
    %c0_i32 = arith.constant 0 : i32
    %2 = arith.maxsi %1, %c0_i32 : i32
    %c0_i32_0 = arith.constant 0 : i32
    %c0_i32_1 = arith.constant 0 : i32
    %c0_i32_2 = arith.constant 0 : i32
    return %arg0, %2, %c0_i32_0, %c0_i32_1 : i32, i32, i32, i32
  }
  func.func @transform_1(%arg0: i32, %arg1: i32, %arg2: i32) -> (i32, i32, i32, i32) {
    %c0_i32 = arith.constant 0 : i32
    %c0_i32_0 = arith.constant 0 : i32
    %c0_i32_1 = arith.constant 0 : i32
    return %arg0, %arg1, %c0_i32, %c0_i32_0 : i32, i32, i32, i32
  }
  func.func @transform_2(%arg0: i32, %arg1: i32, %arg2: i32) -> (i32, i32, i32, i32) {
    %c1_i32 = arith.constant 1 : i32
    %0 = arith.addi %arg1, %c1_i32 : i32
    %c16_i32 = arith.constant 16 : i32
    %1 = arith.muli %0, %c16_i32 : i32
    %c15_i32 = arith.constant 15 : i32
    %2 = arith.minsi %1, %c15_i32 : i32
    %c0_i32 = arith.constant 0 : i32
    %c0_i32_0 = arith.constant 0 : i32
    %c0_i32_1 = arith.constant 0 : i32
    return %arg0, %2, %c0_i32, %c0_i32_0 : i32, i32, i32, i32
  }
  func.func @transform_3(%arg0: i32, %arg1: i32, %arg2: i32) -> (i32, i32, i32) {
    %c0_i32 = arith.constant 0 : i32
    %c0_i32_0 = arith.constant 0 : i32
    %c0_i32_1 = arith.constant 0 : i32
    return %c0_i32, %c0_i32_0, %arg2 : i32, i32, i32
  }
  func.func @transform_4(%arg0: i32, %arg1: i32, %arg2: i32) -> (i32, i32) {
    %c0_i32 = arith.constant 0 : i32
    %c0_i32_0 = arith.constant 0 : i32
    return %c0_i32, %arg2 : i32, i32
  }
  func.func @transform_5(%arg0: i32, %arg1: i32, %arg2: i32) -> (i32, i32, i32, i32) {
    %c0_i32 = arith.constant 0 : i32
    %c0_i32_0 = arith.constant 0 : i32
    return %arg0, %arg1, %c0_i32, %arg2 : i32, i32, i32, i32
  }
}

</mosaic_0001>

<bundles_post_ra>
// kernel: tpu_custom_call.1
= control target key start
LH: loop header
LB: loop body
LE: loop exit
PB: predicated region body
PF: predicated region fallthrough
CT: control target
= control target key end

     0   :  { %s2773_s18 = smov 0   ;;  %s2775_s19 = smov 0   ;;  %s3868_s0 = inlined_call_operand.vmem [shape: bf16[2,16,18,3], index: 0, kind: input, shape index: {}]   ;;  %s3869_s1 = inlined_call_operand.vmem [shape: bf16[2,16,18,3], index: 1, kind: input, shape index: {}]   ;;  %s3870_s2 = inlined_call_operand.vmem [shape: bf16[2,16,18,3], index: 2, kind: input, shape index: {}]   ;;  %s3871_s3 = inlined_call_operand.vmem [shape: bf16[1,27,64], index: 3, kind: input, shape index: {}]   ;;  %s3872_s4 = inlined_call_operand.vmem [shape: f32[1,64], index: 4, kind: input, shape index: {}]   ;;  %s3873_s5 = inlined_call_operand.vmem [shape: bf16[2,16,18,64], index: 5, kind: output, shape index: {}]  }
   0x1   :  { %s2777_s0 = smov 0  }
   0x2 LB: > { %s34_s2 = sadd.s32 1, %s2727_s19  ;;  %p2462_p0 = scmp.ge.s32.totalorder %s2731_s0, 1  ;;  %s2731_s0 = sphi %s2777_s0, %s15_s0   ;;  %s2727_s19 = sphi %s2775_s19, %s3883_s19   ;;  %s2723_s18 = sphi %s2773_s18, %s3882_s18  }
   0x3   : > { %p36_p1 = scmp.ge.s32.totalorder %s34_s2, 2  ;;  %p299_p2 = scmp.lt.s32.totalorder %s2731_s0, 3 }
   0x5   : > { %s3885_s2 = smov (%p36_p1, %s34_s2), 0  ;;  %p300_p3 = pnand %p2462_p0, %p299_p2 }
   0x6   : > { %v2733_v0 = vmov (!%p300_p3), 0   ;;  %p391_p4 = scmp.lt.s32.totalorder (!%p300_p3), %s2723_s18, 1  ;;  %s2734_s20 = smov (!%p300_p3), 3   ;;  %vm838_vm0 = vcmask (!%p300_p3), 1046528   ;;  %vm616_vm1 = vsmask.f32 (!%p300_p3), 7424 }
   0x7   : > { %303 = sbr.rel (%p300_p3) target bundleno = 623 (0x26f), region = 40  ;;  %v2792_v1 = vrot.slane (!%p300_p3), %v2733_v0, 1  ;;  %s2735_s22 = smov (!%p300_p3), 6   ;;  %vm1444_vm2 = vcmask (!%p300_p3), 1044480   ;;  %vm1445_vm3 = vcmask (!%p300_p3), 1045504   ;;  %vm1125_vm4 = vcmask (!%p300_p3), 23552  }
   0x8   : > { %s2736_s26 = smov (!%p300_p3), 9   ;;  %s2737_s27 = smov (!%p300_p3), 12   ;;  %vm1158_vm5 = vcmask (!%p300_p3), 48128   ;;  %vm1191_vm6 = vcmask (!%p300_p3), 72704   ;;  %vm1224_vm7 = vcmask (!%p300_p3), 97280   ;;  %vm1257_vm8 = vcmask (!%p300_p3), 121856  }
   0x9   : > { %805 = vrot.lane.b32.xlu0 (!%p300_p3), %v2792_v1, %s2734_s20  ;;  %s2738_s28 = smov (!%p300_p3), 15   ;;  %s2739_s29 = smov (!%p300_p3), 18   ;;  %vm1290_vm9 = vcmask (!%p300_p3), 146432   ;;  %vm1323_vm10 = vcmask (!%p300_p3), 171008   ;;  %vm1356_vm11 = vcmask (!%p300_p3), 195584   ;;  %vm1411_vm12 = vcmask (!%p300_p3), 220160  }
   0xa   : > { %s2741_s9 = smov (!%p300_p3), 21   ;;  %s2742_s10 = smov (!%p300_p3), 24   ;;  %vm1660_vm13 = vcmask (!%p300_p3), 516096   ;;  %vm1661_vm14 = vsmask.f32 (!%p300_p3), 256 }
   0xb   : > { %vm3376_vm15 = vmand (!%p300_p3), %vm1660_vm13, %vm1661_vm14 }
   0xd   : > { %886 = vrot.lane.b32.xlu0 (!%p300_p3), %v2792_v1, %s2735_s22 }
   0xe   : > { %s3887_s18 = smov (!%p391_p4, %s2723_s18), 1 }
   0xf   : > { %s2640_s21 = smul.u32 192, %s3887_s18 }
  0x11   : > { %s2806_s25 = scalar_lea.vmem %s3869_s1, %s2640_s21  ;;  %s3372_s13 = scalar_lea.vmem %s3873_s5, %s2640_s21 }
  0x12   : > { %v2809_v2 = vld [vmem:[%s2806_s25 + $0x60] sm:$0xff]   ;;  %v2819_v4 = vld [vmem:[%s2806_s25 + $0x54] sm:$0xff]   ;;  %v2678_v5 = vld [vmem:[%s2806_s25 + $0x5c] ss:$0 sps:$4 sm:$0x11]  }
  0x13   : > { %v2812_v3 = vld [vmem:[%s2806_s25] sm:$0xff]   ;;  %934 = vrot.lane.b32.xlu1 %v2809_v2, %s2736_s26  ;;  %v2679_v6 = vld [vmem:[%s2806_s25 + $0x8] ss:$0 sps:$4 sm:$0x11]   ;;  %v862_v8 = vrot.slane %v2819_v4, 1  ;;  %v863_v9 = vrot.slane %v2678_v5, 1 }
  0x14   : > { %918 = vrot.lane.b32.xlu0 %v2812_v3, %s2736_s26  ;;  %v841_v7 = vrot.slane %v2812_v3, 1  ;;  %v2680_v10 = vld [vmem:[%s2806_s25 + $0x68] ss:$0 sps:$4 sm:$0x11]   ;;  %v865_v11 = vrot.slane %v2809_v2, 1  ;;  %v842_v12 = vrot.slane %v2679_v6, 1 }
  0x15   : > { %v710_v13 = vshrl.u32 %v2819_v4, 16  ;;  %v712_v14 = vshll.u32 %v2819_v4, 16  ;;  %v717_v15 = vshll.u32 %v2678_v5, 16  ;;  %v2830_v16 = vsel %vm838_vm0, %v862_v8, %v863_v9  ;;  %v2835_v20 = vld [vmem:[%s2806_s25 + $0xc] sm:$0xff]   ;;  %v2888_v59 = vld [vmem:[%s2806_s25 + $0x18] sm:$0xff]  }
  0x16   : > { %v866_v17 = vrot.slane %v2680_v10, 1  ;;  %v626_v18 = vshrl.u32 %v2812_v3, 16  ;;  %v628_v19 = vshll.u32 %v2812_v3, 16  ;;  %v843_v21 = vsel %vm838_vm0, %v841_v7, %v842_v12  ;;  %v2683_v34 = vld [vmem:[%s2806_s25 + $0x14] ss:$0 sps:$4 sm:$0x11]  }
  0x17   : > { %902 = vrot.lane.b32.xlu1 %v2830_v16, %s2735_s22  ;;  %v714_v22 = vrot.slane %v712_v14, 1  ;;  %v719_v23 = vrot.slane %v717_v15, 1  ;;  %v633_v24 = vshll.u32 %v2679_v6, 16  ;;  %v722_v27 = vshrl.u32 %v2809_v2, 16  ;;  %v2857_v40 = vld [vmem:[%s2806_s25 + $0x6c] sm:$0xff]   ;;  %v2902_v6 = vld [vmem:[%s2806_s25 + $0x78] sm:$0xff]  }
  0x18   : > { %888 = vrot.lane.b32.xlu0 %v843_v21, %s2735_s22  ;;  %v2842_v25 = vsel %vm838_vm0, %v865_v11, %v866_v17  ;;  %v630_v26 = vrot.slane %v628_v19, 1  ;;  %v724_v28 = vshll.u32 %v2809_v2, 16  ;;  %v729_v31 = vshll.u32 %v2680_v10, 16  ;;  %v2684_v45 = vld [vmem:[%s2806_s25 + $0x74] ss:$0 sps:$4 sm:$0x11]  }
  0x19   : > { %v715_v29 = vor.u32 %v714_v22, %v710_v13  ;;  %v635_v30 = vrot.slane %v633_v24, 1  ;;  %v640_v35 = vshll.u32 %v2835_v20, 16  ;;  %v638_v41 = vshrl.u32 %v2835_v20, 16  ;;  %v2687_v62 = vld [vmem:[%s2806_s25 + $0x20] ss:$0 sps:$4 sm:$0x11]  }
  0x1a   : > { %v631_v32 = vor.u32 %v630_v26, %v626_v18  ;;  %v726_v33 = vrot.slane %v724_v28, 1  ;;  %v731_v39 = vrot.slane %v729_v31, 1  ;;  %v645_v43 = vshll.u32 %v2683_v34, 16  ;;  %v2688_v10 = vld [vmem:[%s2806_s25 + $0x80] ss:$0 sps:$4 sm:$0x11]  }
  0x1b   : > { %904 = vrot.lane.b32.xlu1 %v2842_v25, %s2735_s22  ;;  %v2851_v36 = vsel %vm616_vm1, %v715_v29, %v719_v23  ;;  %v642_v42 = vrot.slane %v640_v35, 1  ;;  %v736_v46 = vshll.u32 %v2857_v40, 16  ;;  %v734_v49 = vshrl.u32 %v2857_v40, 16  ;;  %v2701_v11 = vld [vmem:[%s3871_s3] sm:$0xff]   ;;  %v2703_v15 = vld [vmem:[%s3871_s3 + $0x8] sm:$0x3f]  }
  0x1c   : > { %821 = vrot.lane.b32.xlu0 %v2851_v36, %s2734_s20  ;;  %v636_v37 = vsel %vm616_vm1, %v631_v32, %v635_v30  ;;  %v727_v38 = vor.u32 %v726_v33, %v722_v27  ;;  %v647_v48 = vrot.slane %v645_v43, 1  ;;  %v741_v51 = vshll.u32 %v2684_v45, 16  ;;  %2600 = vmatprep.subr.bf16.mxu0 %v2701_v11 }
  0x1d   : > { %v643_v47 = vor.u32 %v642_v42, %v638_v41  ;;  %v738_v50 = vrot.slane %v736_v46, 1  ;;  %v844_v55 = vrot.slane %v2835_v20, 1  ;;  %v845_v56 = vrot.slane %v2683_v34, 1  ;;  %2636 = vmatprep.subr.bf16.mxu1 %v2701_v11  ;;  %2601 = vmatpush3.bf16.msra.mxu0 %v2701_v11  ;;  %v2954_v41 = vld [vmem:[%s2806_s25 + $0x84] sm:$0xff]  }
  0x1e   : > { %v2864_v44 = vsel %vm616_vm1, %v727_v38, %v731_v39  ;;  %v743_v54 = vrot.slane %v741_v51, 1  ;;  %v868_v60 = vrot.slane %v2857_v40, 1  ;;  %v869_v61 = vrot.slane %v2684_v45, 1  ;;  %2638 = vmatpush3.bf16.msra.mxu1 %v2701_v11  ;;  %v2691_v38 = vld [vmem:[%s2806_s25 + $0x2c] ss:$0 sps:$4 sm:$0x11]  }
  0x1f   : > { %807 = vrot.lane.b32.xlu1 %v636_v37, %s2734_s20  ;;  %v2873_v52 = vsel %vm616_vm1, %v643_v47, %v647_v48  ;;  %v739_v53 = vor.u32 %v738_v50, %v734_v49  ;;  %v2885_v58 = vsel %vm838_vm0, %v844_v55, %v845_v56  ;;  %v652_v63 = vshll.u32 %v2888_v59, 16  ;;  %v2692_v46 = vld [vmem:[%s2806_s25 + $0x8c] ss:$0 sps:$4 sm:$0x11]  }
  0x20   : > { %920 = vrot.lane.b32.xlu0 %v2835_v20, %s2736_s26  ;;  %v870_v5 = vsel %vm838_vm0, %v868_v60, %v869_v61  ;;  %v657_v7 = vshll.u32 %v2687_v62, 16  ;;  %v650_v8 = vshrl.u32 %v2888_v59, 16  ;;  %v748_v13 = vshll.u32 %v2902_v6, 16  ;;  %v2976_v61 = vld [vmem:[%s2806_s25 + $0x30] sm:$0xff]  }
  0x21   : > { %v744_v57 = vsel %vm616_vm1, %v739_v53, %v743_v54  ;;  %v654_v9 = vrot.slane %v652_v63, 1  ;;  %v2740_v17 = vmov 65535   ;;  %v746_v22 = vshrl.u32 %v2902_v6, 16 }
  0x22   : > { %v659_v12 = vrot.slane %v657_v7, 1  ;;  %v1446_v18 = vsel %vm1444_vm2, 4294967295, %v2740_v17  ;;  %v750_v23 = vrot.slane %v748_v13, 1  ;;  %v753_v24 = vshll.u32 %v2688_v10, 16 }
  0x23   : > { %823 = vrot.lane.b32.xlu1 %v2864_v44, %s2734_s20  ;;  %v655_v14 = vor.u32 %v654_v9, %v650_v8  ;;  %v1447_v19 = vsel %vm1445_vm3, %v1446_v18, 0  ;;  %v847_v30 = vrot.slane %v2888_v59, 1  ;;  %v848_v31 = vrot.slane %v2687_v62, 1  ;;  %v2988_v9 = vld [vmem:[%s2806_s25 + $0x90] sm:$0xff]  }
  0x24   : > { %962 = vrot.lane.b32.xlu0 %v636_v37, %s2737_s27  ;;  %v751_v27 = vor.u32 %v750_v23, %v746_v22  ;;  %v755_v28 = vrot.slane %v753_v24, 1  ;;  %v871_v33 = vrot.slane %v2902_v6, 1  ;;  %v872_v34 = vrot.slane %v2688_v10, 1  ;;  %v2944_v37 = vld [vmem:[%s2806_s25 + $0x24] sm:$0xff]  }
  0x25   : > { %v660_v26 = vsel %vm616_vm1, %v655_v14, %v659_v12  ;;  %v849_v32 = vsel %vm838_vm0, %v847_v30, %v848_v31  ;;  %v664_v39 = vshll.u32 %v2944_v37, 16  ;;  %v662_v42 = vshrl.u32 %v2944_v37, 16  ;;  %v2696_v13 = vld [vmem:[%s2806_s25 + $0x98] ss:$0 sps:$4 sm:$0x11]  }
  0x26   : > { %v756_v29 = vsel %vm616_vm1, %v751_v27, %v755_v28  ;;  %v873_v35 = vsel %vm838_vm0, %v871_v33, %v872_v34  ;;  %v669_v45 = vshll.u32 %v2691_v38, 16  ;;  %v760_v47 = vshll.u32 %v2954_v41, 16 }
  0x27   : > { %936 = vrot.lane.b32.xlu1 %v2857_v40, %s2736_s26  ;;  %v666_v43 = vrot.slane %v664_v39, 1  ;;  %v758_v50 = vshrl.u32 %v2954_v41, 16  ;;  %v850_v56 = vrot.slane %v2944_v37, 1  ;;  %v874_v62 = vrot.slane %v2954_v41, 1 }
  0x28   : > { %964 = vrot.lane.b32.xlu0 %v2873_v52, %s2737_s27  ;;  %v671_v49 = vrot.slane %v669_v45, 1  ;;  %v762_v51 = vrot.slane %v760_v47, 1  ;;  %v875_v63 = vrot.slane %v2692_v46, 1  ;;  %v676_v7 = vshll.u32 %v2976_v61, 16 }
  0x29   : > { %v667_v48 = vor.u32 %v666_v43, %v662_v42  ;;  %v674_v10 = vshrl.u32 %v2976_v61, 16  ;;  %v772_v14 = vshll.u32 %v2988_v9, 16  ;;  %v777_v22 = vshll.u32 %v2696_v13, 16 }
  0x2a   : > { %v763_v54 = vor.u32 %v762_v51, %v758_v50  ;;  %v876_v8 = vsel %vm838_vm0, %v874_v62, %v875_v63  ;;  %v678_v11 = vrot.slane %v676_v7, 1  ;;  %v853_v31 = vrot.slane %v2976_v61, 1  ;;  %v2700_v63 = vld [vmem:[%s2806_s25 + $0xa4] ss:$0 sps:$4 sm:$0x11]  }
  0x2b   : > { %978 = vrot.lane.b32.xlu1 %v2864_v44, %s2737_s27  ;;  %v672_v53 = vsel %vm616_vm1, %v667_v48, %v671_v49  ;;  %v779_v27 = vrot.slane %v777_v22, 1  ;;  %v878_v39 = vrot.slane %v2696_v13, 1  ;;  %v3045_v49 = vld [vmem:[%s2806_s25 + $0x3c] sm:$0xff]   ;;  %vm2163_vm2 = vcmask 519168  }
  0x2c   : > { %997 = vrot.lane.b32.xlu0 %v843_v21, %s2738_s28  ;;  %v1449_v21 = vand.u32 %v2703_v15, %v1447_v19  ;;  %v679_v15 = vor.u32 %v678_v11, %v674_v10  ;;  %v770_v19 = vshrl.u32 %v2988_v9, 16  ;;  %vm1841_vm3 = vsmask.f32 4368 }
  0x2e   : > { %2602 = vmatprep.subr.bf16.mxu0 %v1449_v21  ;;  %2637 = vmatprep.subr.bf16.mxu1 %v1449_v21 }
  0x2f   : > { %980 = vrot.lane.b32.xlu1 %v744_v57, %s2737_s27  ;;  %2603 = vmatpush3.bf16.msra.mxu0 %v1449_v21 }
  0x30   : > { %999 = vrot.lane.b32.xlu0 %v2885_v58, %s2738_s28  ;;  %2639 = vmatpush3.bf16.msra.mxu1 %v1449_v21  ;;  %v774_v21 = vrot.slane %v772_v14, 1  ;;  %v789_v14 = vshll.u32 %v2700_v63, 16 }
  0x32   : > { %v791_v22 = vrot.slane %v789_v14, 1 }
  0x33   : > { %1013 = vrot.lane.b32.xlu1 %v2842_v25, %s2738_s28 }
  0x34   : > { %1029 = vrot.lane.b32.xlu0 %v2835_v20, %s2739_s29 }
  0x37   : > { %1015 = vrot.lane.b32.xlu1 %v870_v5, %s2738_s28 }
  0x38   : > { %1031 = vrot.lane.b32.xlu0 %v2888_v59, %s2739_s29 }
  0x3b   : > { %1045 = vrot.lane.b32.xlu1 %v2857_v40, %s2739_s29 }
  0x3c   : > { %1061 = vrot.lane.b32.xlu0 %v2873_v52, %s2741_s9 }
  0x3f   : > { %1047 = vrot.lane.b32.xlu1 %v2902_v6, %s2739_s29 }
  0x40   : > { %1063 = vrot.lane.b32.xlu0 %v660_v26, %s2741_s9 }
  0x43   : > { %1077 = vrot.lane.b32.xlu1 %v744_v57, %s2741_s9 }
  0x44   : > { %1093 = vrot.lane.b32.xlu0 %v2885_v58, %s2742_s10 }
  0x47   : > { %1079 = vrot.lane.b32.xlu1 %v756_v29, %s2741_s9 }
  0x48   : > { %809 = vrot.lane.b32.xlu0 %v2873_v52, %s2734_s20  ;;  %v765_v52 = vshll.u32 %v2692_v46, 16 }
  0x4a   : > { %v767_v55 = vrot.slane %v765_v52, 1  ;;  %v2699_v52 = vld [vmem:[%s2806_s25 + $0x44] ss:$0 sps:$4 sm:$0x11]  }
  0x4b   : > { %1109 = vrot.lane.b32.xlu1 %v870_v5, %s2742_s10 }
  0x4c   : > { %1095 = vrot.lane.b32.xlu0 %v849_v32, %s2742_s10 }
  0x4f   : > { %825 = vrot.lane.b32.xlu1 %v744_v57, %s2734_s20  ;;  %v851_v57 = vrot.slane %v2691_v38, 1  ;;  %v877_v38 = vrot.slane %v2988_v9, 1 }
  0x50   : > { %811 = vrot.lane.b32.xlu0 %v660_v26, %s2734_s20 }
  0x51   : > { %v852_v60 = vsel %vm838_vm0, %v850_v56, %v851_v57  ;;  %v3033_v45 = vsel %vm838_vm0, %v877_v38, %v878_v39  ;;  %v686_v57 = vshrl.u32 %v3045_v49, 16 }
  0x53   : > { %1111 = vrot.lane.b32.xlu1 %v873_v35, %s2742_s10 }
  0x54   : > { %890 = vrot.lane.b32.xlu0 %v2885_v58, %s2735_s22  ;;  %v768_v58 = vsel %vm616_vm1, %v763_v54, %v767_v55  ;;  %v3061_v55 = vld [vmem:[%s2806_s25 + $0x9c] sm:$0xff]  }
  0x57   : > { %827 = vrot.lane.b32.xlu1 %v756_v29, %s2734_s20 }
  0x58   : > { %892 = vrot.lane.b32.xlu0 %v849_v32, %s2735_s22 }
  0x5b   : > { %906 = vrot.lane.b32.xlu1 %v870_v5, %s2735_s22  ;;  %v2695_v5 = vld [vmem:[%s2806_s25 + $0x38] ss:$0 sps:$4 sm:$0x11]  }
  0x5c   : > { %922 = vrot.lane.b32.xlu0 %v2888_v59, %s2736_s26  ;;  %v681_v12 = vshll.u32 %v2695_v5, 16 }
  0x5e   : > { %v683_v17 = vrot.slane %v681_v12, 1  ;;  %v782_v12 = vshrl.u32 %v3061_v55, 16 }
  0x5f   : > { %908 = vrot.lane.b32.xlu1 %v873_v35, %s2735_s22 }
  0x60   : > { %924 = vrot.lane.b32.xlu0 %v2944_v37, %s2736_s26  ;;  %v684_v23 = vsel %vm616_vm1, %v679_v15, %v683_v17 }
  0x63   : > { %938 = vrot.lane.b32.xlu1 %v2902_v6, %s2736_s26 }
  0x64   : > { %966 = vrot.lane.b32.xlu0 %v660_v26, %s2737_s27  ;;  %v775_v26 = vor.u32 %v774_v21, %v770_v19 }
  0x66   : > { %v780_v30 = vsel %vm616_vm1, %v775_v26, %v779_v27  ;;  %v856_v26 = vrot.slane %v3045_v49, 1  ;;  %v857_v27 = vrot.slane %v2699_v52, 1 }
  0x67   : > { %940 = vrot.lane.b32.xlu1 %v2954_v41, %s2736_s26 }
  0x68   : > { %968 = vrot.lane.b32.xlu0 %v672_v53, %s2737_s27 }
  0x6b   : > { %982 = vrot.lane.b32.xlu1 %v756_v29, %s2737_s27 }
  0x6c   : > { %1001 = vrot.lane.b32.xlu0 %v849_v32, %s2738_s28  ;;  %v854_v32 = vrot.slane %v2695_v5, 1  ;;  %v784_v5 = vshll.u32 %v3061_v55, 16 }
  0x6e   : > { %v855_v34 = vsel %vm838_vm0, %v853_v31, %v854_v32  ;;  %v786_v13 = vrot.slane %v784_v5, 1 }
  0x6f   : > { %984 = vrot.lane.b32.xlu1 %v768_v58, %s2737_s27 }
  0x70   : > { %1003 = vrot.lane.b32.xlu0 %v852_v60, %s2738_s28  ;;  %v787_v21 = vor.u32 %v786_v13, %v782_v12 }
  0x72   : > { %v3099_v38 = vsel %vm616_vm1, %v787_v21, %v791_v22 }
  0x73   : > { %1017 = vrot.lane.b32.xlu1 %v873_v35, %s2738_s28 }
  0x74   : > { %1033 = vrot.lane.b32.xlu0 %v2944_v37, %s2739_s29 }
  0x77   : > { %1019 = vrot.lane.b32.xlu1 %v876_v8, %s2738_s28 }
  0x78   : > { %1035 = vrot.lane.b32.xlu0 %v2976_v61, %s2739_s29 }
  0x7b   : > { %1049 = vrot.lane.b32.xlu1 %v2954_v41, %s2739_s29  ;;  %v2999_v18 = vpop.permute.xlu0 %805 }
  0x7c   : > { %1065 = vrot.lane.b32.xlu0 %v672_v53, %s2741_s9  ;;  %v1127_v32 = vsel %vm1125_vm4, 0, %v2999_v18  ;;  %v880_v18 = vrot.slane %v3061_v55, 1 }
  0x7f   : > { %1051 = vrot.lane.b32.xlu1 %v2988_v9, %s2739_s29  ;;  %v3006_v24 = vpop.permute.xlu0 %886 }
  0x80   : > { %1067 = vrot.lane.b32.xlu0 %v684_v23, %s2741_s9 }
  0x83   : > { %1081 = vrot.lane.b32.xlu1 %v768_v58, %s2741_s9 }
  0x84   : > { %1097 = vrot.lane.b32.xlu0 %v852_v60, %s2742_s10 }
  0x85   : > { %v3009_v28 = vpop.permute.xlu1 %934 }
  0x86   : > { %v3012_v29 = vpop.permute.xlu0 %918 }
  0x87   : > { %1083 = vrot.lane.b32.xlu1 %v780_v30, %s2741_s9 }
  0x88   : > { %813 = vrot.lane.b32.xlu0 %v672_v53, %s2734_s20  ;;  %v688_v53 = vshll.u32 %v3045_v49, 16 }
  0x89   : > { %v3018_v33 = vpop.permute.xlu1 %902 }
  0x8a   : > { %v3021_v35 = vpop.permute.xlu0 %888 }
  0x8b   : > { %1113 = vrot.lane.b32.xlu1 %v876_v8, %s2742_s10 }
  0x8c   : > { %1099 = vrot.lane.b32.xlu0 %v855_v34, %s2742_s10 }
  0x8d   : > { %v3026_v42 = vpop.permute.xlu1 %904 }
  0x8e   : > { %v3028_v43 = vpop.permute.xlu0 %821 }
  0x8f   : > { %829 = vrot.lane.b32.xlu1 %v768_v58, %s2734_s20  ;;  %v690_v58 = vrot.slane %v688_v53, 1  ;;  %v3102_v53 = vsel %vm838_vm0, %v856_v26, %v857_v27  ;;  %v3156_v27 = vld [vmem:[%s2806_s25 + $0xb0] ss:$0 sps:$4 sm:$0x11]  }
  0x90   : > { %815 = vrot.lane.b32.xlu0 %v684_v23, %s2734_s20 }
  0x91   : > { %v3035_v46 = vpop.permute.xlu1 %807 }
  0x92   : > { %v3037_v47 = vpop.permute.xlu0 %920 }
  0x93   : > { %1115 = vrot.lane.b32.xlu1 %v3033_v45, %s2742_s10 }
  0x94   : > { %894 = vrot.lane.b32.xlu0 %v852_v60, %s2735_s22  ;;  %v693_v60 = vshll.u32 %v2699_v52, 16 }
  0x95   : > { %v3042_v48 = vpop.permute.xlu1 %823 }
  0x96   : > { %v3047_v50 = vpop.permute.xlu0 %962  ;;  %v695_v10 = vrot.slane %v693_v60, 1  ;;  %v3117_v60 = vld [vmem:[%s2806_s25 + $0x50] ss:$0 sps:$4 sm:$0x11]  }
  0x97   : > { %831 = vrot.lane.b32.xlu1 %v780_v30, %s2734_s20  ;;  %v705_v22 = vshll.u32 %v3117_v60, 16 }
  0x98   : > { %896 = vrot.lane.b32.xlu0 %v855_v34, %s2735_s22 }
  0x99   : > { %v3051_v51 = vpop.permute.xlu1 %936 }
  0x9a   : > { %v3055_v54 = vpop.permute.xlu0 %964 }
  0x9b   : > { %910 = vrot.lane.b32.xlu1 %v876_v8, %s2735_s22  ;;  %v691_v8 = vor.u32 %v690_v58, %v686_v57  ;;  %v3105_v57 = vld [vmem:[%s2806_s25 + $0x48] sm:$0xff]  }
  0x9c   : > { %926 = vrot.lane.b32.xlu0 %v2976_v61, %s2736_s26  ;;  %v700_v5 = vshll.u32 %v3105_v57, 16  ;;  %v698_v14 = vshrl.u32 %v3105_v57, 16 }
  0x9d   : > { %v3063_v56 = vpop.permute.xlu1 %978  ;;  %v3083_v17 = vsel %vm616_vm1, %v691_v8, %v695_v10 }
  0x9e   : > { %v998_v62 = vpop.permute.xlu0 %997  ;;  %v702_v21 = vrot.slane %v700_v5, 1 }
  0x9f   : > { %912 = vrot.lane.b32.xlu1 %v3033_v45, %s2735_s22 }
  0xa0   : > { %928 = vrot.lane.b32.xlu0 %v3045_v49, %s2736_s26 }
  0xa1   : > { %v3072_v7 = vpop.permute.xlu1 %980 }
  0xa2   : > { %v3074_v11 = vpop.permute.xlu0 %999 }
  0xa3   : > { %942 = vrot.lane.b32.xlu1 %v2988_v9, %s2736_s26 }
  0xa4   : > { %970 = vrot.lane.b32.xlu0 %v684_v23, %s2737_s27 }
  0xa5   : > { %v3080_v15 = vpop.permute.xlu1 %1013 }
  0xa6   : > { %v1030_v19 = vpop.permute.xlu0 %1029 }
  0xa7   : > { %944 = vrot.lane.b32.xlu1 %v3061_v55, %s2736_s26 }
  0xa8   : > { %972 = vrot.lane.b32.xlu0 %v3083_v17, %s2737_s27 }
  0xa9   : > { %v3089_v23 = vpop.permute.xlu1 %1015 }
  0xaa   : > { %v3092_v31 = vpop.permute.xlu0 %1031 }
  0xab   : > { %986 = vrot.lane.b32.xlu1 %v780_v30, %s2737_s27  ;;  %v1160_v30 = vsel %vm1158_vm5, %v1127_v32, %v3006_v24 }
  0xac   : > { %1005 = vrot.lane.b32.xlu0 %v855_v34, %s2738_s28  ;;  %v881_v34 = vrot.slane %v2700_v63, 1  ;;  %v1193_v24 = vsel %vm1191_vm6, %v1160_v30, %v3012_v29  ;;  %v1143_v63 = vsel %vm1125_vm4, %v2819_v4, %v3028_v43  ;;  %v1129_v29 = vsel %vm1125_vm4, %v2812_v3, %v3035_v46  ;;  %v3139_v43 = vld [vmem:[%s2806_s25 + $0xa8] sm:$0xff]  }
  0xad   : > { %v1046_v39 = vpop.permute.xlu1 %1045  ;;  %v1226_v10 = vsel %vm1224_vm7, %v1193_v24, %v3047_v50  ;;  %v1176_v3 = vsel %vm1158_vm5, %v1143_v63, %v3018_v33  ;;  %v1162_v26 = vsel %vm1158_vm5, %v1129_v29, %v3021_v35  ;;  %v796_v33 = vshll.u32 %v3139_v43, 16 }
  0xae   : > { %v1062_v52 = vpop.permute.xlu0 %1061  ;;  %v3130_v12 = vsel %vm838_vm0, %v880_v18, %v881_v34  ;;  %v1259_v13 = vsel %vm1257_vm8, %v1226_v10, %v998_v62  ;;  %v1209_v32 = vsel %vm1191_vm6, %v1176_v3, %v3009_v28  ;;  %v703_v30 = vor.u32 %v702_v21, %v698_v14 }
  0xaf   : > { %988 = vrot.lane.b32.xlu1 %v3099_v38, %s2737_s27  ;;  %v1292_v50 = vsel %vm1290_vm9, %v1259_v13, %v1030_v19  ;;  %v707_v35 = vrot.slane %v705_v22, 1  ;;  %v1195_v18 = vsel %vm1191_vm6, %v1162_v26, %v3037_v47  ;;  %v1242_v34 = vsel %vm1224_vm7, %v1209_v32, %v3063_v56 }
  0xb0   : > { %1007 = vrot.lane.b32.xlu0 %v3102_v53, %s2738_s28  ;;  %v1325_v46 = vsel %vm1323_vm10, %v1292_v50, %v1062_v52  ;;  %v1228_v24 = vsel %vm1224_vm7, %v1195_v18, %v3055_v54  ;;  %v1275_v63 = vsel %vm1257_vm8, %v1242_v34, %v3080_v15  ;;  %v794_v28 = vshrl.u32 %v3139_v43, 16 }
  0xb1   : > { %v3114_v58 = vpop.permute.xlu1 %1047  ;;  %v1261_v10 = vsel %vm1257_vm8, %v1228_v24, %v3074_v11  ;;  %v1308_v47 = vsel %vm1290_vm9, %v1275_v63, %v1046_v39  ;;  %v798_v56 = vrot.slane %v796_v33, 1  ;;  %v801_v29 = vshll.u32 %v3156_v27, 16 }
  0xb2   : > { %v1064_v8 = vpop.permute.xlu0 %1063  ;;  %v1145_v54 = vsel %vm1125_vm4, %v2809_v2, %v3042_v48  ;;  %v1294_v15 = vsel %vm1290_vm9, %v1261_v10, %v3092_v31  ;;  %v3187_v11 = vsel %vm616_vm1, %v703_v30, %v707_v35  ;;  %v860_v32 = vrot.slane %v3117_v60, 1 }
  0xb3   : > { %1021 = vrot.lane.b32.xlu1 %v3033_v45, %s2738_s28  ;;  %v1327_v39 = vsel %vm1323_vm10, %v1294_v15, %v1064_v8  ;;  %v1178_v48 = vsel %vm1158_vm5, %v1145_v54, %v3026_v42  ;;  %v799_v31 = vor.u32 %v798_v56, %v794_v28  ;;  %v803_v8 = vrot.slane %v801_v29, 1  ;;  %v2707_v56 = vld [vmem:[%s2806_s25 + $0xb4] sm:$0xff]  }
  0xb4   : > { %1037 = vrot.lane.b32.xlu0 %v3045_v49, %s2739_s29  ;;  %v883_v60 = vrot.slane %v3139_v43, 1  ;;  %v884_v18 = vrot.slane %v3156_v27, 1  ;;  %v953_v15 = vshll.u32 %v2707_v56, 16 }
  0xb5   : > { %v1078_v45 = vpop.permute.xlu1 %1077 }
  0xb6   : > { %v1094_v62 = vpop.permute.xlu0 %1093  ;;  %v1341_v13 = vsel %vm1323_vm10, %v1308_v47, %v1078_v45  ;;  %v1211_v45 = vsel %vm1191_vm6, %v1178_v48, %v3051_v51  ;;  %v804_v51 = vsel %vm616_vm1, %v799_v31, %v803_v8 }
  0xb7   : > { %1023 = vrot.lane.b32.xlu1 %v3130_v12, %s2738_s28  ;;  %v1358_v19 = vsel %vm1356_vm11, %v1325_v46, %v1094_v62  ;;  %v1244_v46 = vsel %vm1224_vm7, %v1211_v45, %v3072_v7  ;;  %v859_v7 = vrot.slane %v3105_v57, 1 }
  0xb8   : > { %1039 = vrot.lane.b32.xlu0 %v3105_v57, %s2739_s29  ;;  %2604 = vmatprep.mubr.msk.bf16.mxu0 %vm1411_vm12, %v1358_v19  ;;  %v1277_v42 = vsel %vm1257_vm8, %v1244_v46, %v3089_v23 }
  0xb9   : > { %v1080_v52 = vpop.permute.xlu1 %1079  ;;  %v1310_v26 = vsel %vm1290_vm9, %v1277_v42, %v3114_v58  ;;  %v861_v35 = vsel %vm838_vm0, %v859_v7, %v860_v32 }
  0xba   : > { %v3165_v5 = vpop.permute.xlu0 %809  ;;  %v1343_v19 = vsel %vm1323_vm10, %v1310_v26, %v1080_v52 }
  0xbb   : > { %1053 = vrot.lane.b32.xlu1 %v3061_v55, %s2739_s29  ;;  %v1131_v26 = vsel %vm1125_vm4, %v2835_v20, %v3165_v5 }
  0xbc   : > { %1069 = vrot.lane.b32.xlu0 %v3083_v17, %s2741_s9 }
  0xbd   : > { %v1110_v50 = vpop.permute.xlu1 %1109 }
  0xbe   : > { %v1096_v14 = vpop.permute.xlu0 %1095  ;;  %v1374_v21 = vsel %vm1356_vm11, %v1341_v13, %v1110_v50 }
  0xbf   : > { %v1360_v22 = vsel %vm1356_vm11, %v1327_v39, %v1096_v14  ;;  %1055 = vrot.lane.b32.xlu1 %v3139_v43, %s2739_s29  ;;  %2620 = vmatprep.mubr.msk.bf16.mxu1 %vm1411_vm12, %v1374_v21  ;;  %v955_v39 = vrot.slane %v953_v15, 1 }
  0xc0   : > { %1071 = vrot.lane.b32.xlu0 %v3187_v11, %s2741_s9  ;;  %2605 = vmatmul.mubr.msk.bf16.vlgmr.msra.gmra.mrb[0].mxu0 %vm1411_vm12, %v1360_v22 }
  0xc1   : > { %v3202_v3 = vpop.permute.xlu1 %825 }
  0xc2   : > { %v3206_v62 = vpop.permute.xlu0 %811 }
  0xc3   : > { %1085 = vrot.lane.b32.xlu1 %v3099_v38, %s2741_s9 }
  0xc4   : > { %1101 = vrot.lane.b32.xlu0 %v3102_v53, %s2742_s10 }
  0xc5   : > { %v1112_v33 = vpop.permute.xlu1 %1111 }
  0xc6   : > { %v1376_v23 = vsel %vm1356_vm11, %v1343_v19, %v1112_v33  ;;  %v891_v30 = vpop.permute.xlu0 %890  ;;  %v994_v19 = vrot.slane %v2707_v56, 1 }
  0xc7   : > { %1087 = vrot.lane.b32.xlu1 %v804_v51, %s2741_s9  ;;  %2621 = vmatmul.mubr.msk.bf16.vlgmr.msra.gmra.mrb[0].mxu1 %vm1411_vm12, %v1376_v23  ;;  %v1164_v7 = vsel %vm1158_vm5, %v1131_v26, %v891_v30  ;;  %v1133_v30 = vsel %vm1125_vm4, %v2888_v59, %v3206_v62 }
  0xc8   : > { %817 = vrot.lane.b32.xlu0 %v3083_v17, %s2734_s20  ;;  %v885_v17 = vsel %vm838_vm0, %v883_v60, %v884_v18 }
  0xc9   : > { %v3225_v58 = vpop.permute.xlu1 %827 }
  0xca   : > { %v3228_v52 = vpop.permute.xlu0 %892 }
  0xcb   : > { %1117 = vrot.lane.b32.xlu1 %v3130_v12, %s2742_s10  ;;  %v1166_v59 = vsel %vm1158_vm5, %v1133_v30, %v3228_v52  ;;  %v1690_v30 = vld [vmem:[%s3372_s13 + $0x6c] sm:$0x1] }
  0xcc   : > { %1103 = vrot.lane.b32.xlu0 %v861_v35, %s2742_s10 }
  0xcd   : > { %v3235_v34 = vpop.permute.xlu1 %906 }
  0xce   : > { %v923_v24 = vpop.permute.xlu0 %922 }
  0xcf   : > { %833 = vrot.lane.b32.xlu1 %v3099_v38, %s2734_s20  ;;  %v1197_v32 = vsel %vm1191_vm6, %v1164_v7, %v923_v24  ;;  %v1663_v7 = vld [vmem:[%s3372_s13] sm:$0x1] }
  0xd0   : > { %819 = vrot.lane.b32.xlu0 %v3187_v11, %s2734_s20 }
  0xd1   : > { %v3242_v63 = vpop.permute.xlu1 %908 }
  0xd2   : > { %v3244_v28 = vpop.permute.xlu0 %924 }
  0xd3   : > { %1119 = vrot.lane.b32.xlu1 %v885_v17, %s2742_s10 }
  0xd4   : > { %898 = vrot.lane.b32.xlu0 %v3102_v53, %s2735_s22  ;;  %v2708_v53 = vld [vmem:[%s2806_s25 + $0xbc] ss:$0 sps:$4 sm:$0x11]  }
  0xd5   : > { %v939_v27 = vpop.permute.xlu1 %938  ;;  %v958_v14 = vshll.u32 %v2708_v53, 16  ;;  %v995_v33 = vrot.slane %v2708_v53, 1 }
  0xd6   : > { %v967_v10 = vpop.permute.xlu0 %966 }
  0xd7   : > { %835 = vrot.lane.b32.xlu1 %v804_v51, %s2734_s20  ;;  %v960_v31 = vrot.slane %v958_v14, 1  ;;  %v996_v20 = vsel %vm838_vm0, %v994_v19, %v995_v33  ;;  %vm1711_vm0 = vsmask.f32 7938 }
  0xd8   : > { %900 = vrot.lane.b32.xlu0 %v861_v35, %s2735_s22 }
  0xd9   : > { %v3251_v38 = vpop.permute.xlu1 %940 }
  0xda   : > { %v969_v47 = vpop.permute.xlu0 %968 }
  0xdb   : > { %914 = vrot.lane.b32.xlu1 %v3130_v12, %s2735_s22  ;;  %v951_v12 = vshrl.u32 %v2707_v56, 16 }
  0xdc   : > { %930 = vrot.lane.b32.xlu0 %v3105_v57, %s2736_s26 }
  0xdd   : > { %v983_v29 = vpop.permute.xlu1 %982  ;;  %v956_v48 = vor.u32 %v955_v39, %v951_v12 }
  0xde   : > { %v1002_v54 = vpop.permute.xlu0 %1001 }
  0xdf   : > { %916 = vrot.lane.b32.xlu1 %v885_v17, %s2735_s22 }
  0xe0   : > { %932 = vrot.lane.b32.xlu0 %v2819_v4, %s2736_s26 }
  0xe1   : > { %v3262_v13 = vpop.permute.xlu1 %984 }
  0xe2   : > { %v1004_v50 = vpop.permute.xlu0 %1003 }
  0xe3   : > { %946 = vrot.lane.b32.xlu1 %v3139_v43, %s2736_s26 }
  0xe4   : > { %974 = vrot.lane.b32.xlu0 %v3187_v11, %s2737_s27  ;;  %v961_v11 = vsel %vm616_vm1, %v956_v48, %v960_v31  ;;  %vm3383_vm1 = vmand %vm1660_vm13, %vm1711_vm0 }
  0xe5   : > { %v1018_v21 = vpop.permute.xlu1 %1017 }
  0xe6   : > { %v1034_v22 = vpop.permute.xlu0 %1033 }
  0xe7   : > { %948 = vrot.lane.b32.xlu1 %v2707_v56, %s2736_s26 }
  0xe8   : > { %976 = vrot.lane.b32.xlu0 %v2851_v36, %s2737_s27 }
  0xe9   : > { %v1020_v8 = vpop.permute.xlu1 %1019 }
  0xea   : > { %v1036_v45 = vpop.permute.xlu0 %1035 }
  0xeb   : > { %990 = vrot.lane.b32.xlu1 %v804_v51, %s2737_s27 }
  0xec   : > { %1009 = vrot.lane.b32.xlu0 %v861_v35, %s2738_s28  ;;  %v1230_v35 = vsel %vm1224_vm7, %v1197_v32, %v967_v10  ;;  %v1664_v32 = vsel %vm3376_vm15, 0, %v1663_v7 }
  0xed   : > { %v1050_v46 = vpop.permute.xlu1 %1049  ;;  %v1263_v60 = vsel %vm1257_vm8, %v1230_v35, %v1002_v54  ;;  %1665 = vst [vmem:[%s3372_s13] sm:$0x1] %v1664_v32 }
  0xee   : > { %v1066_v42 = vpop.permute.xlu0 %1065  ;;  %v1296_v5 = vsel %vm1290_vm9, %v1263_v60, %v1034_v22 }
  0xef   : > { %992 = vrot.lane.b32.xlu1 %v961_v11, %s2737_s27  ;;  %v1329_v24 = vsel %vm1323_vm10, %v1296_v5, %v1066_v42 }
  0xf0   : > { %1011 = vrot.lane.b32.xlu0 %v2830_v16, %s2738_s28 }
  0xf1   : > { %v1052_v51 = vpop.permute.xlu1 %1051 }
  0xf2   : > { %v1068_v23 = vpop.permute.xlu0 %1067 }
  0xf3   : > { %1025 = vrot.lane.b32.xlu1 %v885_v17, %s2738_s28  ;;  %v1147_v17 = vsel %vm1125_vm4, %v2857_v40, %v3202_v3  ;;  %v1199_v40 = vsel %vm1191_vm6, %v1166_v59, %v3244_v28 }
  0xf4   : > { %1041 = vrot.lane.b32.xlu0 %v2819_v4, %s2739_s29  ;;  %v1180_v4 = vsel %vm1158_vm5, %v1147_v17, %v3235_v34  ;;  %v1232_v34 = vsel %vm1224_vm7, %v1199_v40, %v969_v47  ;;  %v1687_v17 = vld [vmem:[%s3372_s13 + $0x60] sm:$0x1]  ;;  %v1740_v40 = vld [vmem:[%s3372_s13 + $0x74] sm:$0x1] }
  0xf5   : > { %v1082_v18 = vpop.permute.xlu1 %1081  ;;  %v1213_v62 = vsel %vm1191_vm6, %v1180_v4, %v939_v27 }
  0xf6   : > { %v1098_v53 = vpop.permute.xlu0 %1097  ;;  %v1246_v3 = vsel %vm1224_vm7, %v1213_v62, %v983_v29 }
  0xf7   : > { %v1362_v10 = vsel %vm1356_vm11, %v1329_v24, %v1098_v53  ;;  %1027 = vrot.lane.b32.xlu1 %v996_v20, %s2738_s28  ;;  %v1279_v12 = vsel %vm1257_vm8, %v1246_v3, %v1018_v21  ;;  %v1691_v53 = vsel %vm3376_vm15, 0, %v1690_v30  ;;  %v1741_v3 = vsel %vm3383_vm1, 0, %v1740_v40 }
  0xf8   : > { %1043 = vrot.lane.b32.xlu0 %v2809_v2, %s2739_s29  ;;  %2608 = vmatprep.mubr.msk.bf16.mxu0 %vm1411_vm12, %v1362_v10  ;;  %v1265_v2 = vsel %vm1257_vm8, %v1232_v34, %v1004_v50  ;;  %v1312_v52 = vsel %vm1290_vm9, %v1279_v12, %v1050_v46  ;;  %1692 = vst [vmem:[%s3372_s13 + $0x6c] sm:$0x1] %v1691_v53  ;;  %v1688_v10 = vsel %vm3376_vm15, 0, %v1687_v17  ;;  %v1737_v34 = vld [vmem:[%s3372_s13 + $0x68] sm:$0x1] }
  0xf9   : > { %v1084_v54 = vpop.permute.xlu1 %1083  ;;  %v1298_v27 = vsel %vm1290_vm9, %v1265_v2, %v1036_v45  ;;  %v1345_v28 = vsel %vm1323_vm10, %v1312_v52, %v1082_v18  ;;  %1689 = vst [vmem:[%s3372_s13 + $0x60] sm:$0x1] %v1688_v10  ;;  %1742 = vst [vmem:[%s3372_s13 + $0x74] sm:$0x1] %v1741_v3  ;;  %v1738_v12 = vsel %vm3383_vm1, 0, %v1737_v34 }
  0xfa   : > { %v3309_v15 = vpop.permute.xlu0 %813  ;;  %v1331_v39 = vsel %vm1323_vm10, %v1298_v27, %v1068_v23  ;;  %v1716_v23 = vld [vmem:[%s3372_s13 + $0x14] sm:$0x1]  ;;  %1739 = vst [vmem:[%s3372_s13 + $0x68] sm:$0x1] %v1738_v12  ;;  %v1672_v34 = vld [vmem:[%s3372_s13 + $0x24] sm:$0x1] }
  0xfb   : > { %1057 = vrot.lane.b32.xlu1 %v2707_v56, %s2739_s29  ;;  %v1149_v56 = vsel %vm1125_vm4, %v2902_v6, %v3225_v58  ;;  %v1717_v60 = vsel %vm3383_vm1, 0, %v1716_v23  ;;  %v1673_v12 = vsel %vm3376_vm15, 0, %v1672_v34 }
  0xfc   : > { %1073 = vrot.lane.b32.xlu0 %v2851_v36, %s2741_s9  ;;  %v1182_v36 = vsel %vm1158_vm5, %v1149_v56, %v3242_v63  ;;  %1718 = vst [vmem:[%s3372_s13 + $0x14] sm:$0x1] %v1717_v60  ;;  %1674 = vst [vmem:[%s3372_s13 + $0x24] sm:$0x1] %v1673_v12 }
  0xfd   : > { %v1114_v29 = vpop.permute.xlu1 %1113  ;;  %v1215_v21 = vsel %vm1191_vm6, %v1182_v36, %v3251_v38 }
  0xfe   : > { %v1378_v47 = vsel %vm1356_vm11, %v1345_v28, %v1114_v29  ;;  %v1100_v14 = vpop.permute.xlu0 %1099  ;;  %v1248_v6 = vsel %vm1224_vm7, %v1215_v21, %v3262_v13  ;;  %v1135_v29 = vsel %vm1125_vm4, %v2944_v37, %v3309_v15 }
  0xff   : > { %v1364_v50 = vsel %vm1356_vm11, %v1331_v39, %v1100_v14  ;;  %1059 = vrot.lane.b32.xlu1 %v2733_v0, %s2739_s29  ;;  %2624 = vmatprep.mubr.msk.bf16.mxu1 %vm1411_vm12, %v1378_v47  ;;  %v1281_v0 = vsel %vm1257_vm8, %v1248_v6, %v1020_v8 }
 0x100   : > { %1075 = vrot.lane.b32.xlu0 %v2864_v44, %s2741_s9  ;;  %2609 = vmatmul.mubr.msk.bf16.gmra.mrb[4].mxu0 %vm1411_vm12, %v1364_v50  ;;  %v1314_v63 = vsel %vm1290_vm9, %v1281_v0, %v1052_v51 }
 0x101   : > { %v3336_v22 = vpop.permute.xlu1 %829  ;;  %v1347_v44 = vsel %vm1323_vm10, %v1314_v63, %v1084_v54 }
 0x102   : > { %v3340_v58 = vpop.permute.xlu0 %815  ;;  %v1151_v15 = vsel %vm1125_vm4, %v2954_v41, %v3336_v22 }
 0x103   : > { %1089 = vrot.lane.b32.xlu1 %v961_v11, %s2741_s9  ;;  %v1137_v0 = vsel %vm1125_vm4, %v2976_v61, %v3340_v58 }
 0x104   : > { %1105 = vrot.lane.b32.xlu0 %v2830_v16, %s2742_s10 }
 0x105   : > { %v1116_v38 = vpop.permute.xlu1 %1115 }
 0x106   : > { %v1380_v48 = vsel %vm1356_vm11, %v1347_v44, %v1116_v38  ;;  %v895_v31 = vpop.permute.xlu0 %894 }
 0x107   : > { %1091 = vrot.lane.b32.xlu1 %v2792_v1, %s2741_s9  ;;  %2625 = vmatmul.mubr.msk.bf16.gmra.mrb[4].mxu1 %vm1411_vm12, %v1380_v48  ;;  %v1168_v39 = vsel %vm1158_vm5, %v1135_v29, %v895_v31  ;;  %v1669_v29 = vld [vmem:[%s3372_s13 + $0x18] sm:$0x1] }
 0x108   : > { %1107 = vrot.lane.b32.xlu0 %v2842_v25, %s2742_s10 }
 0x109   : > { %v3354_v13 = vpop.permute.xlu1 %831 }
 0x10a   : > { %v3356_v8 = vpop.permute.xlu0 %896  ;;  %v1153_v23 = vsel %vm1125_vm4, %v2988_v9, %v3354_v13 }
 0x10b   : > { %1121 = vrot.lane.b32.xlu1 %v996_v20, %s2742_s10  ;;  %v1713_v20 = vld [vmem:[%s3372_s13 + $0x8] sm:$0x1]  ;;  %v1170_v48 = vsel %vm1158_vm5, %v1137_v0, %v3356_v8 }
 0x10c   : > { %v1714_v5 = vsel %vm3383_vm1, 0, %v1713_v20 }
 0x10d   : > { %v3359_v16 = vpop.permute.xlu1 %910  ;;  %1715 = vst [vmem:[%s3372_s13 + $0x8] sm:$0x1] %v1714_v5 }
 0x10e   : > { %v927_v45 = vpop.permute.xlu0 %926  ;;  %v1184_v38 = vsel %vm1158_vm5, %v1151_v15, %v3359_v16 }
 0x10f   : > { %1123 = vrot.lane.b32.xlu1 %v2792_v1, %s2742_s10  ;;  %v1666_v1 = vld [vmem:[%s3372_s13 + $0xc] sm:$0x1]  ;;  %v1201_v14 = vsel %vm1191_vm6, %v1168_v39, %v927_v45  ;;  %v1670_v39 = vsel %vm3376_vm15, 0, %v1669_v29 }
 0x110   : > { %v1667_v19 = vsel %vm3376_vm15, 0, %v1666_v1  ;;  %1671 = vst [vmem:[%s3372_s13 + $0x18] sm:$0x1] %v1670_v39 }
 0x111   : > { %v3363_v11 = vpop.permute.xlu1 %912  ;;  %1668 = vst [vmem:[%s3372_s13 + $0xc] sm:$0x1] %v1667_v19 }
 0x112   : > { %v3365_v46 = vpop.permute.xlu0 %928  ;;  %v1186_v60 = vsel %vm1158_vm5, %v1153_v23, %v3363_v11 }
 0x113   : > { %v1203_v58 = vsel %vm1191_vm6, %v1170_v48, %v3365_v46 }
 0x115   : > { %v943_v25 = vpop.permute.xlu1 %942 }
 0x116   : > { %v971_v42 = vpop.permute.xlu0 %970  ;;  %v1217_v31 = vsel %vm1191_vm6, %v1184_v38, %v943_v25  ;;  %v1746_v38 = vld [vmem:[%s3372_s13 + $0x8c] sm:$0x1] }
 0x117   : > { %v1234_v50 = vsel %vm1224_vm7, %v1201_v14, %v971_v42  ;;  %v1747_v48 = vsel %vm3383_vm1, 0, %v1746_v38 }
 0x118   : > { %1748 = vst [vmem:[%s3372_s13 + $0x8c] sm:$0x1] %v1747_v48 }
 0x119   : > { %v3388_v51 = vpop.permute.xlu1 %944 }
 0x11a   : > { %v973_v35 = vpop.permute.xlu0 %972  ;;  %v1219_v20 = vsel %vm1191_vm6, %v1186_v60, %v3388_v51 }
 0x11b   : > { %v1236_v41 = vsel %vm1224_vm7, %v1203_v58, %v973_v35 }
 0x11d   : > { %v987_v18 = vpop.permute.xlu1 %986 }
 0x11e   : > { %v1006_v24 = vpop.permute.xlu0 %1005  ;;  %v1250_v45 = vsel %vm1224_vm7, %v1217_v31, %v987_v18  ;;  %v1743_v31 = vld [vmem:[%s3372_s13 + $0x80] sm:$0x1] }
 0x11f   : > { %v1267_v36 = vsel %vm1257_vm8, %v1234_v50, %v1006_v24  ;;  %v1719_v50 = vld [vmem:[%s3372_s13 + $0x20] sm:$0x1] }
 0x121   : > { %v989_v4 = vpop.permute.xlu1 %988 }
 0x122   : > { %v1008_v59 = vpop.permute.xlu0 %1007  ;;  %v1252_v18 = vsel %vm1224_vm7, %v1219_v20, %v989_v4 }
 0x123   : > { %v1269_v16 = vsel %vm1257_vm8, %v1236_v41, %v1008_v59 }
 0x125   : > { %v1022_v62 = vpop.permute.xlu1 %1021 }
 0x126   : > { %v1038_v54 = vpop.permute.xlu0 %1037  ;;  %v1283_v22 = vsel %vm1257_vm8, %v1250_v45, %v1022_v62 }
 0x127   : > { %v1300_v21 = vsel %vm1290_vm9, %v1267_v36, %v1038_v54 }
 0x129   : > { %v1024_v2 = vpop.permute.xlu1 %1023 }
 0x12a   : > { %v1040_v52 = vpop.permute.xlu0 %1039  ;;  %v1285_v9 = vsel %vm1257_vm8, %v1252_v18, %v1024_v2 }
 0x12b   : > { %v1302_v8 = vsel %vm1290_vm9, %v1269_v16, %v1040_v52 }
 0x12d   : > { %v1054_v27 = vpop.permute.xlu1 %1053 }
 0x12e   : > { %v1070_v28 = vpop.permute.xlu0 %1069  ;;  %v1316_v1 = vsel %vm1290_vm9, %v1283_v22, %v1054_v27 }
 0x12f   : > { %v1333_v63 = vsel %vm1323_vm10, %v1300_v21, %v1070_v28  ;;  %v1720_v21 = vsel %vm3383_vm1, 0, %v1719_v50 }
 0x130   : > { %1721 = vst [vmem:[%s3372_s13 + $0x20] sm:$0x1] %v1720_v21 }
 0x131   : > { %v1056_v47 = vpop.permute.xlu1 %1055 }
 0x132   : > { %v1072_v56 = vpop.permute.xlu0 %1071  ;;  %v1318_v13 = vsel %vm1290_vm9, %v1285_v9, %v1056_v47  ;;  %v1722_v47 = vld [vmem:[%s3372_s13 + $0x2c] sm:$0x1] }
 0x133   : > { %v1335_v7 = vsel %vm1323_vm10, %v1302_v8, %v1072_v56  ;;  %v1723_v56 = vsel %vm3383_vm1, 0, %v1722_v47 }
 0x134   : > { %1724 = vst [vmem:[%s3372_s13 + $0x2c] sm:$0x1] %v1723_v56 }
 0x135   : > { %v1086_v6 = vpop.permute.xlu1 %1085 }
 0x136   : > { %v1102_v37 = vpop.permute.xlu0 %1101  ;;  %v1349_v25 = vsel %vm1323_vm10, %v1316_v1, %v1086_v6  ;;  %v1696_v6 = vld [vmem:[%s3372_s13 + $0x84] sm:$0x1] }
 0x137   : > { %v1366_v44 = vsel %vm1356_vm11, %v1333_v63, %v1102_v37  ;;  %v1697_v63 = vsel %vm3376_vm15, 0, %v1696_v6  ;;  %v1693_v37 = vld [vmem:[%s3372_s13 + $0x78] sm:$0x1] }
 0x138   : > { %2612 = vmatprep.mubr.msk.bf16.mxu0 %vm1411_vm12, %v1366_v44  ;;  %1698 = vst [vmem:[%s3372_s13 + $0x84] sm:$0x1] %v1697_v63  ;;  %v1694_v44 = vsel %vm3376_vm15, 0, %v1693_v37 }
 0x139   : > { %v1088_v61 = vpop.permute.xlu1 %1087  ;;  %1695 = vst [vmem:[%s3372_s13 + $0x78] sm:$0x1] %v1694_v44 }
 0x13a   : > { %v3443_v42 = vpop.permute.xlu0 %817  ;;  %v1351_v24 = vsel %vm1323_vm10, %v1318_v13, %v1088_v61  ;;  %v1744_v61 = vsel %vm3383_vm1, 0, %v1743_v31 }
 0x13b   : > { %1745 = vst [vmem:[%s3372_s13 + $0x80] sm:$0x1] %v1744_v61  ;;  %v1139_v16 = vsel %vm1125_vm4, %v3045_v49, %v3443_v42 }
 0x13d   : > { %v1118_v19 = vpop.permute.xlu1 %1117 }
 0x13e   : > { %v1382_v46 = vsel %vm1356_vm11, %v1349_v25, %v1118_v19  ;;  %v1104_v32 = vpop.permute.xlu0 %1103 }
 0x13f   : > { %v1368_v35 = vsel %vm1356_vm11, %v1335_v7, %v1104_v32  ;;  %2628 = vmatprep.mubr.msk.bf16.mxu1 %vm1411_vm12, %v1382_v46 }
 0x140   : > { %2613 = vmatmul.mubr.msk.bf16.gmra.mrb[8].mxu0 %vm1411_vm12, %v1368_v35 }
 0x141   : > { %v3463_v5 = vpop.permute.xlu1 %833 }
 0x142   : > { %v820_v30 = vpop.permute.xlu0 %819 }
 0x143   : > { %v1141_v25 = vsel %vm1125_vm4, %v3105_v57, %v820_v30  ;;  %v1155_v57 = vsel %vm1125_vm4, %v3061_v55, %v3463_v5 }
 0x145   : > { %v1120_v53 = vpop.permute.xlu1 %1119 }
 0x146   : > { %v1384_v11 = vsel %vm1356_vm11, %v1351_v24, %v1120_v53  ;;  %v899_v17 = vpop.permute.xlu0 %898 }
 0x147   : > { %2629 = vmatmul.mubr.msk.bf16.gmra.mrb[8].mxu1 %vm1411_vm12, %v1384_v11  ;;  %v1172_v1 = vsel %vm1158_vm5, %v1139_v16, %v899_v17 }
 0x149   : > { %v3471_v51 = vpop.permute.xlu1 %835 }
 0x14a   : > { %v901_v10 = vpop.permute.xlu0 %900  ;;  %v1157_v5 = vsel %vm1125_vm4, %v3139_v43, %v3471_v51  ;;  %vm3572_vm4 = vmand %vm2163_vm2, %vm1711_vm0 }
 0x14b   : > { %v1174_v23 = vsel %vm1158_vm5, %v1141_v25, %v901_v10 }
 0x14d   : > { %v915_v4 = vpop.permute.xlu1 %914 }
 0x14e   : > { %v931_v59 = vpop.permute.xlu0 %930  ;;  %v1188_v9 = vsel %vm1158_vm5, %v1155_v57, %v915_v4 }
 0x14f   : > { %v1205_v19 = vsel %vm1191_vm6, %v1172_v1, %v931_v59 }
 0x151   : > { %v3473_v62 = vpop.permute.xlu1 %916 }
 0x152   : > { %v933_v54 = vpop.permute.xlu0 %932 }
 0x153   : > { %v1207_v49 = vsel %vm1191_vm6, %v1174_v23, %v933_v54  ;;  %v1190_v54 = vsel %vm1158_vm5, %v1157_v5, %v3473_v62  ;;  %vm3579_vm5 = vmor %vm1661_vm14, %vm1841_vm3 }
 0x155   : > { %v947_v40 = vpop.permute.xlu1 %946 }
 0x156   : > { %v975_v3 = vpop.permute.xlu0 %974  ;;  %v1221_v24 = vsel %vm1191_vm6, %v1188_v9, %v947_v40 }
 0x157   : > { %v1238_v46 = vsel %vm1224_vm7, %v1205_v19, %v975_v3 }
 0x159   : > { %v3479_v2 = vpop.permute.xlu1 %948 }
 0x15a   : > { %v977_v52 = vpop.permute.xlu0 %976  ;;  %v1223_v3 = vsel %vm1191_vm6, %v1190_v54, %v3479_v2  ;;  %v3557_v2 = vld [vmem:[%s3872_s4] ss:$0 sm:$0xff] }
 0x15b   : > { %v1240_v18 = vsel %vm1224_vm7, %v1207_v49, %v977_v52 }
 0x15d   : > { %v991_v27 = vpop.permute.xlu1 %990 }
 0x15e   : > { %v1010_v28 = vpop.permute.xlu0 %1009  ;;  %v1254_v17 = vsel %vm1224_vm7, %v1221_v24, %v991_v27 }
 0x15f   : > { %v1271_v32 = vsel %vm1257_vm8, %v1238_v46, %v1010_v28 }
 0x161   : > { %v993_v14 = vpop.permute.xlu1 %992 }
 0x162   : > { %v1012_v36 = vpop.permute.xlu0 %1011  ;;  %v1256_v52 = vsel %vm1224_vm7, %v1223_v3, %v993_v14  ;;  %v2170_v3 = vld [vmem:[%s3372_s13 + $0x8] sm:$0x1] }
 0x163   : > { %v1273_v13 = vsel %vm1257_vm8, %v1240_v18, %v1012_v36 }
 0x165   : > { %v1026_v0 = vpop.permute.xlu1 %1025 }
 0x166   : > { %v1042_v15 = vpop.permute.xlu0 %1041  ;;  %v1287_v4 = vsel %vm1257_vm8, %v1254_v17, %v1026_v0  ;;  %v1678_v0 = vld [vmem:[%s3372_s13 + $0x3c] sm:$0x1] }
 0x167   : > { %v1304_v35 = vsel %vm1290_vm9, %v1271_v32, %v1042_v15  ;;  %v1679_v15 = vsel %vm3376_vm15, 0, %v1678_v0 }
 0x168   : > { %1680 = vst [vmem:[%s3372_s13 + $0x3c] sm:$0x1] %v1679_v15 }
 0x169   : > { %v1028_v58 = vpop.permute.xlu1 %1027 }
 0x16a   : > { %v1044_v45 = vpop.permute.xlu0 %1043  ;;  %v1289_v51 = vsel %vm1257_vm8, %v1256_v52, %v1028_v58 }
 0x16b   : > { %v1306_v53 = vsel %vm1290_vm9, %v1273_v13, %v1044_v45  ;;  %v2165_v13 = vld [vmem:[%s3372_s13] sm:$0xf] }
 0x16d   : > { %v1058_v41 = vpop.permute.xlu1 %1057 }
 0x16e   : > { %v1074_v22 = vpop.permute.xlu0 %1073  ;;  %v1320_v40 = vsel %vm1290_vm9, %v1287_v4, %v1058_v41 }
 0x16f   : > { %v1337_v42 = vsel %vm1323_vm10, %v1304_v35, %v1074_v22 }
 0x171   : > { %v1060_v8 = vpop.permute.xlu1 %1059 }
 0x172   : > { %v1076_v7 = vpop.permute.xlu0 %1075  ;;  %v1322_v62 = vsel %vm1290_vm9, %v1289_v51, %v1060_v8 }
 0x173   : > { %v1339_v10 = vsel %vm1323_vm10, %v1306_v53, %v1076_v7  ;;  %v2173_v7 = vld [vmem:[%s3372_s13 + $0xc] sm:$0xf] }
 0x175   : > { %v1090_v60 = vpop.permute.xlu1 %1089 }
 0x176   : > { %v1106_v20 = vpop.permute.xlu0 %1105  ;;  %v1353_v34 = vsel %vm1323_vm10, %v1320_v40, %v1090_v60 }
 0x177   : > { %v1370_v30 = vsel %vm1356_vm11, %v1337_v42, %v1106_v20 }
 0x178   : > { %2616 = vmatprep.mubr.msk.bf16.mxu0 %vm1411_vm12, %v1370_v30 }
 0x179   : > { %v1092_v11 = vpop.permute.xlu1 %1091 }
 0x17a   : > { %v1108_v55 = vpop.permute.xlu0 %1107  ;;  %v1355_v27 = vsel %vm1323_vm10, %v1322_v62, %v1092_v11  ;;  %v1675_v62 = vld [vmem:[%s3372_s13 + $0x30] sm:$0x1] }
 0x17b   : > { %v1372_v59 = vsel %vm1356_vm11, %v1339_v10, %v1108_v55  ;;  %v2177_v55 = vld [vmem:[%s3372_s13 + $0x14] sm:$0x1]  ;;  %v1676_v15 = vsel %vm3376_vm15, 0, %v1675_v62 }
 0x17c   : > { %2617 = vmatmul.mubr.msk.bf16.gmra.mrb[12].mxu0 %vm1411_vm12, %v1372_v59  ;;  %1677 = vst [vmem:[%s3372_s13 + $0x30] sm:$0x1] %v1676_v15 }
 0x17d   : > { %v1122_v12 = vpop.permute.xlu1 %1121 }
 0x17e   : > { %v1386_v43 = vsel %vm1356_vm11, %v1353_v34, %v1122_v12 }
 0x17f   : > { %2632 = vmatprep.mubr.msk.bf16.mxu1 %vm1411_vm12, %v1386_v43 }
 0x181   : > { %v1124_v28 = vpop.permute.xlu1 %1123 }
 0x182   : > { %v1388_v29 = vsel %vm1356_vm11, %v1355_v27, %v1124_v28 }
 0x183   : > { %2633 = vmatmul.mubr.msk.bf16.gmra.mrb[12].mxu1 %vm1411_vm12, %v1388_v29 }
 0x193   : > { %v2606_v39 = vpop.f32.mrb[0].mxu0 }
 0x194   : > { %v1494_v47 = vadd.f32 %v2606_v39, %v3557_v2  ;;  %v1485_v14 = vpop.f32.mrb[1].mxu0 }
 0x195   : > { %v1486_v56 = vadd.f32 %v3557_v2, %v1485_v14  ;;  %v2607_v50 = vpop.f32.mrb[2].mxu0  ;;  %v1725_v14 = vld [vmem:[%s3372_s13 + $0x38] sm:$0x1] }
 0x196   : > { %v1614_v36 = vmax.f32 %v1494_v47, 0.0  ;;  %v1497_v21 = vadd.f32 %v2607_v50, %v3557_v2  ;;  %v1488_v6 = vpop.f32.mrb[3].mxu0  ;;  %v1728_v47 = vld [vmem:[%s3372_s13 + $0x44] sm:$0x1] }
 0x197   : > { %v1612_v63 = vmax.f32 %v1486_v56, 0.0  ;;  %v1489_v37 = vadd.f32 %v3557_v2, %v1488_v6  ;;  %v2229_v6 = vld [vmem:[%s3372_s13 + $0x6c] sm:$0xf] }
 0x198   : > { %v2552_v44 = vpack.c.bf16 %v1614_v36, %v1614_v36  ;;  %v1615_v38 = vmax.f32 %v1497_v21, 0.0 }
 0x199   : > { %v2550_v48 = vpack.c.bf16 %v1612_v63, %v1612_v63  ;;  %v1613_v31 = vmax.f32 %v1489_v37, 0.0 }
 0x19a   : > { %v1861_v61 = vshrl.u32 %v2552_v44, 16  ;;  %v1864_v58 = vshll.u32 %v2552_v44, 16  ;;  %v2553_v45 = vpack.c.bf16 %v1615_v38, %v1615_v38  ;;  %v2622_v41 = vpop.f32.mrb[0].mxu1  ;;  %v1702_v44 = vld [vmem:[%s3372_s13 + $0x9c] sm:$0x1] }
 0x19b   : > { %v1844_v22 = vshrl.u32 %v2550_v48, 16  ;;  %v1847_v16 = vshll.u32 %v2550_v48, 16  ;;  %v2551_v1 = vpack.c.bf16 %v1613_v31, %v1613_v31  ;;  %v1558_v8 = vadd.f32 %v2622_v41, %v3557_v2  ;;  %v1549_v25 = vpop.f32.mrb[1].mxu1  ;;  %v2222_v48 = vld [vmem:[%s3372_s13 + $0x60] sm:$0xf] }
 0x19c   : > { %v1863_v19 = vrot.slane %v1861_v61, 7  ;;  %v1869_v46 = vshrl.u32 %v2553_v45, 16  ;;  %v1872_v32 = vshll.u32 %v2553_v45, 16  ;;  %v1550_v23 = vadd.f32 %v3557_v2, %v1549_v25  ;;  %v2623_v35 = vpop.f32.mrb[2].mxu1 }
 0x19d   : > { %v1846_v49 = vrot.slane %v1844_v22, 7  ;;  %v1852_v42 = vshrl.u32 %v2551_v1, 16  ;;  %v1855_v20 = vshll.u32 %v2551_v1, 16  ;;  %v1630_v57 = vmax.f32 %v1558_v8, 0.0  ;;  %v1552_v18 = vpop.f32.mrb[3].mxu1 }
 0x19e   : > { %v1866_v30 = vor.u32 %v1864_v58, %v1863_v19  ;;  %v1867_v9 = vrot.slane %v1863_v19, 4  ;;  %v1871_v24 = vrot.slane %v1869_v46, 7  ;;  %v1628_v53 = vmax.f32 %v1550_v23, 0.0  ;;  %v1699_v58 = vld [vmem:[%s3372_s13 + $0x90] sm:$0x1] }
 0x19f   : > { %v1849_v11 = vor.u32 %v1847_v16, %v1846_v49  ;;  %v1850_v17 = vrot.slane %v1846_v49, 4  ;;  %v1854_v5 = vrot.slane %v1852_v42, 7  ;;  %v2568_v4 = vpack.c.bf16 %v1630_v57, %v1630_v57  ;;  %v1752_v16 = vld [vmem:[%s3372_s13 + $0xa4] sm:$0x1] }
 0x1a0   : > { %v2174_v59 = vsel %vm3572_vm4, %v1866_v30, %v2173_v7  ;;  %v1874_v54 = vor.u32 %v1872_v32, %v1871_v24  ;;  %v1876_v40 = vrot.slane %v1871_v24, 4  ;;  %v2566_v34 = vpack.c.bf16 %v1628_v53, %v1628_v53  ;;  %v1749_v7 = vld [vmem:[%s3372_s13 + $0x98] sm:$0x1]  ;;  %v2233_v24 = vld [vmem:[%s3372_s13 + $0x74] sm:$0x1] }
 0x1a1   : > { %2175 = vst [vmem:[%s3372_s13 + $0xc] sm:$0xf] %v2174_v59  ;;  %v2166_v12 = vsel %vm3572_vm4, %v1849_v11, %v2165_v13  ;;  %v1857_v52 = vor.u32 %v1855_v20, %v1854_v5  ;;  %v1859_v43 = vrot.slane %v1854_v5, 4  ;;  %v1997_v51 = vshrl.u32 %v2568_v4, 16  ;;  %v2226_v53 = vld [vmem:[%s3372_s13 + $0x68] sm:$0x1] }
 0x1a2   : > { %2167 = vst [vmem:[%s3372_s13] sm:$0xf] %v2166_v12  ;;  %v1875_v27 = vsel %vm3579_vm5, %v1867_v9, %v1874_v54  ;;  %v2178_v28 = vsel %vm3376_vm15, %v1876_v40, %v2177_v55  ;;  %v2000_v29 = vshll.u32 %v2568_v4, 16  ;;  %v1980_v39 = vshrl.u32 %v2566_v34, 16 }
 0x1a3   : > { %2176 = vst.msk [vmem:[%s3372_s13 + $0x10] sm:$0xf] %vm2163_vm2, %v1875_v27  ;;  %2179 = vst [vmem:[%s3372_s13 + $0x14] sm:$0x1] %v2178_v28  ;;  %v1858_v56 = vsel %vm3579_vm5, %v1850_v17, %v1857_v52  ;;  %v2171_v50 = vsel %vm3376_vm15, %v1859_v43, %v2170_v3  ;;  %v1999_v36 = vrot.slane %v1997_v51, 7  ;;  %v1983_v21 = vshll.u32 %v2566_v34, 16 }
 0x1a4   : > { %2169 = vst.msk [vmem:[%s3372_s13 + $0x4] sm:$0xf] %vm2163_vm2, %v1858_v56  ;;  %2172 = vst [vmem:[%s3372_s13 + $0x8] sm:$0x1] %v2171_v50  ;;  %v1982_v0 = vrot.slane %v1980_v39, 7  ;;  %v1561_v63 = vadd.f32 %v2623_v35, %v3557_v2  ;;  %v1553_v37 = vadd.f32 %v3557_v2, %v1552_v18  ;;  %v1729_v31 = vsel %vm3383_vm1, 0, %v1728_v47 }
 0x1a5   : > { %v2002_v38 = vor.u32 %v2000_v29, %v1999_v36  ;;  %v1726_v61 = vsel %vm3383_vm1, 0, %v1725_v14  ;;  %1730 = vst [vmem:[%s3372_s13 + $0x44] sm:$0x1] %v1729_v31  ;;  %v1703_v8 = vsel %vm3376_vm15, 0, %v1702_v44  ;;  %v1700_v25 = vsel %vm3376_vm15, 0, %v1699_v58 }
 0x1a6   : > { %v1985_v45 = vor.u32 %v1983_v21, %v1982_v0  ;;  %v1631_v41 = vmax.f32 %v1561_v63, 0.0  ;;  %v1629_v22 = vmax.f32 %v1553_v37, 0.0  ;;  %1727 = vst [vmem:[%s3372_s13 + $0x38] sm:$0x1] %v1726_v61  ;;  %v1753_v19 = vsel %vm3383_vm1, 0, %v1752_v16 }
 0x1a7   : > { %v2230_v1 = vsel %vm3572_vm4, %v2002_v38, %v2229_v6  ;;  %1704 = vst [vmem:[%s3372_s13 + $0x9c] sm:$0x1] %v1703_v8  ;;  %1701 = vst [vmem:[%s3372_s13 + $0x90] sm:$0x1] %v1700_v25  ;;  %v1750_v35 = vsel %vm3383_vm1, 0, %v1749_v7  ;;  %v2003_v9 = vrot.slane %v1999_v36, 4 }
 0x1a8   : > { %2231 = vst [vmem:[%s3372_s13 + $0x6c] sm:$0xf] %v2230_v1  ;;  %v2223_v46 = vsel %vm3572_vm4, %v1985_v45, %v2222_v48  ;;  %v2569_v32 = vpack.c.bf16 %v1631_v41, %v1631_v41  ;;  %v2567_v23 = vpack.c.bf16 %v1629_v22, %v1629_v22  ;;  %1754 = vst [vmem:[%s3372_s13 + $0xa4] sm:$0x1] %v1753_v19  ;;  %v1986_v13 = vrot.slane %v1982_v0, 4 }
 0x1a9   : > { %2224 = vst [vmem:[%s3372_s13 + $0x60] sm:$0xf] %v2223_v46  ;;  %1751 = vst [vmem:[%s3372_s13 + $0x98] sm:$0x1] %v1750_v35  ;;  %v1684_v3 = vld [vmem:[%s3372_s13 + $0x54] sm:$0x1] }
 0x1aa   : > { %v2005_v49 = vshrl.u32 %v2569_v32, 16  ;;  %v1988_v42 = vshrl.u32 %v2567_v23, 16  ;;  %v2008_v57 = vshll.u32 %v2569_v32, 16  ;;  %v1991_v30 = vshll.u32 %v2567_v23, 16  ;;  %v2187_v61 = vld [vmem:[%s3372_s13 + $0x24] sm:$0xf] }
 0x1ab   : > { %v1685_v12 = vsel %vm3376_vm15, 0, %v1684_v3  ;;  %v2180_v32 = vld [vmem:[%s3372_s13 + $0x18] sm:$0xf] }
 0x1ac   : > { %v2007_v20 = vrot.slane %v2005_v49, 7  ;;  %v1990_v18 = vrot.slane %v1988_v42, 7  ;;  %1686 = vst [vmem:[%s3372_s13 + $0x54] sm:$0x1] %v1685_v12  ;;  %v1731_v12 = vld [vmem:[%s3372_s13 + $0x50] sm:$0x1] }
 0x1ae   : > { %v2010_v11 = vor.u32 %v2008_v57, %v2007_v20  ;;  %v2012_v17 = vrot.slane %v2007_v20, 4  ;;  %v1993_v55 = vor.u32 %v1991_v30, %v1990_v18  ;;  %v1995_v5 = vrot.slane %v1990_v18, 4  ;;  %v2191_v20 = vld [vmem:[%s3372_s13 + $0x2c] sm:$0x1] }
 0x1b0   : > { %v2011_v4 = vsel %vm3579_vm5, %v2003_v9, %v2010_v11  ;;  %v2234_v59 = vsel %vm3376_vm15, %v2012_v17, %v2233_v24  ;;  %v1994_v54 = vsel %vm3579_vm5, %v1986_v13, %v1993_v55  ;;  %v2227_v40 = vsel %vm3376_vm15, %v1995_v5, %v2226_v53  ;;  %v2184_v24 = vld [vmem:[%s3372_s13 + $0x20] sm:$0x1] }
 0x1b1   : > { %2232 = vst.msk [vmem:[%s3372_s13 + $0x70] sm:$0xf] %vm2163_vm2, %v2011_v4  ;;  %2235 = vst [vmem:[%s3372_s13 + $0x74] sm:$0x1] %v2234_v59  ;;  %v1681_v4 = vld [vmem:[%s3372_s13 + $0x48] sm:$0x1] }
 0x1b2   : > { %2225 = vst.msk [vmem:[%s3372_s13 + $0x64] sm:$0xf] %vm2163_vm2, %v1994_v54  ;;  %2228 = vst [vmem:[%s3372_s13 + $0x68] sm:$0x1] %v2227_v40 }
 0x1d3   : > { %v2610_v34 = vpop.f32.mrb[4].mxu0 }
 0x1d4   : > { %v1510_v52 = vadd.f32 %v2610_v34, %v3557_v2  ;;  %v1501_v43 = vpop.f32.mrb[5].mxu0  ;;  %v1734_v34 = vld [vmem:[%s3372_s13 + $0x5c] sm:$0x1] }
 0x1d5   : > { %v1502_v51 = vadd.f32 %v3557_v2, %v1501_v43  ;;  %v2611_v62 = vpop.f32.mrb[6].mxu0 }
 0x1d6   : > { %v1618_v27 = vmax.f32 %v1510_v52, 0.0  ;;  %v1513_v28 = vadd.f32 %v2611_v62, %v3557_v2  ;;  %v1504_v29 = vpop.f32.mrb[7].mxu0  ;;  %v2243_v62 = vld [vmem:[%s3372_s13 + $0x84] sm:$0xf] }
 0x1d7   : > { %v1616_v39 = vmax.f32 %v1502_v51, 0.0  ;;  %v1505_v47 = vadd.f32 %v3557_v2, %v1504_v29 }
 0x1d8   : > { %v2556_v14 = vpack.c.bf16 %v1618_v27, %v1618_v27  ;;  %v1619_v56 = vmax.f32 %v1513_v28, 0.0  ;;  %v1708_v28 = vld [vmem:[%s3372_s13 + $0xb4] sm:$0x1] }
 0x1d9   : > { %v2554_v50 = vpack.c.bf16 %v1616_v39, %v1616_v39  ;;  %v1617_v36 = vmax.f32 %v1505_v47, 0.0 }
 0x1da   : > { %v1895_v21 = vshrl.u32 %v2556_v14, 16  ;;  %v1898_v6 = vshll.u32 %v2556_v14, 16  ;;  %v2557_v0 = vpack.c.bf16 %v1619_v56, %v1619_v56  ;;  %v2626_v63 = vpop.f32.mrb[4].mxu1  ;;  %v1682_v14 = vsel %vm3376_vm15, 0, %v1681_v4  ;;  %v1705_v56 = vld [vmem:[%s3372_s13 + $0xa8] sm:$0x1] }
 0x1db   : > { %v1878_v37 = vshrl.u32 %v2554_v50, 16  ;;  %v1881_v15 = vshll.u32 %v2554_v50, 16  ;;  %v2555_v44 = vpack.c.bf16 %v1617_v36, %v1617_v36  ;;  %v1574_v38 = vadd.f32 %v2626_v63, %v3557_v2  ;;  %v1565_v48 = vpop.f32.mrb[5].mxu1  ;;  %v1758_v50 = vld [vmem:[%s3372_s13 + $0xbc] sm:$0x1] }
 0x1dc   : > { %v1897_v31 = vrot.slane %v1895_v21, 7  ;;  %v1903_v58 = vshrl.u32 %v2557_v0, 16  ;;  %v1906_v45 = vshll.u32 %v2557_v0, 16  ;;  %v1566_v41 = vadd.f32 %v3557_v2, %v1565_v48  ;;  %v2627_v22 = vpop.f32.mrb[6].mxu1  ;;  %v2236_v21 = vld [vmem:[%s3372_s13 + $0x78] sm:$0xf] }
 0x1dd   : > { %v1880_v16 = vrot.slane %v1878_v37, 7  ;;  %v1886_v1 = vshrl.u32 %v2555_v44, 16  ;;  %v1889_v8 = vshll.u32 %v2555_v44, 16  ;;  %v1634_v25 = vmax.f32 %v1574_v38, 0.0  ;;  %v1568_v19 = vpop.f32.mrb[7].mxu1 }
 0x1de   : > { %v1900_v7 = vor.u32 %v1898_v6, %v1897_v31  ;;  %v1901_v46 = vrot.slane %v1897_v31, 4  ;;  %v1905_v23 = vrot.slane %v1903_v58, 7  ;;  %v1632_v35 = vmax.f32 %v1566_v41, 0.0  ;;  %1683 = vst [vmem:[%s3372_s13 + $0x48] sm:$0x1] %v1682_v14 }
 0x1df   : > { %v1883_v49 = vor.u32 %v1881_v15, %v1880_v16  ;;  %v1884_v42 = vrot.slane %v1880_v16, 4  ;;  %v1888_v57 = vrot.slane %v1886_v1, 7  ;;  %v2572_v18 = vpack.c.bf16 %v1634_v25, %v1634_v25  ;;  %v1755_v63 = vld [vmem:[%s3372_s13 + $0xb0] sm:$0x1] }
 0x1e0   : > { %v2188_v30 = vsel %vm3572_vm4, %v1900_v7, %v2187_v61  ;;  %v1908_v9 = vor.u32 %v1906_v45, %v1905_v23  ;;  %v1910_v13 = vrot.slane %v1905_v23, 4  ;;  %v2570_v53 = vpack.c.bf16 %v1632_v35, %v1632_v35  ;;  %v2247_v23 = vld [vmem:[%s3372_s13 + $0x8c] sm:$0x1]  ;;  %v2240_v35 = vld [vmem:[%s3372_s13 + $0x80] sm:$0x1] }
 0x1e1   : > { %2189 = vst [vmem:[%s3372_s13 + $0x24] sm:$0xf] %v2188_v30  ;;  %v2181_v11 = vsel %vm3572_vm4, %v1883_v49, %v2180_v32  ;;  %v1891_v17 = vor.u32 %v1889_v8, %v1888_v57  ;;  %v1893_v55 = vrot.slane %v1888_v57, 4  ;;  %v2031_v5 = vshrl.u32 %v2572_v18, 16 }
 0x1e2   : > { %2182 = vst [vmem:[%s3372_s13 + $0x18] sm:$0xf] %v2181_v11  ;;  %v1909_v59 = vsel %vm3579_vm5, %v1901_v46, %v1908_v9  ;;  %v2192_v54 = vsel %vm3376_vm15, %v1910_v13, %v2191_v20  ;;  %v2034_v40 = vshll.u32 %v2572_v18, 16  ;;  %v2014_v3 = vshrl.u32 %v2570_v53, 16 }
 0x1e3   : > { %2190 = vst.msk [vmem:[%s3372_s13 + $0x28] sm:$0xf] %vm2163_vm2, %v1909_v59  ;;  %2193 = vst [vmem:[%s3372_s13 + $0x2c] sm:$0x1] %v2192_v54  ;;  %v1892_v52 = vsel %vm3579_vm5, %v1884_v42, %v1891_v17  ;;  %v2185_v43 = vsel %vm3376_vm15, %v1893_v55, %v2184_v24  ;;  %v2033_v51 = vrot.slane %v2031_v5, 7  ;;  %v2017_v27 = vshll.u32 %v2570_v53, 16 }
 0x1e4   : > { %2183 = vst.msk [vmem:[%s3372_s13 + $0x1c] sm:$0xf] %vm2163_vm2, %v1892_v52  ;;  %2186 = vst [vmem:[%s3372_s13 + $0x20] sm:$0x1] %v2185_v43  ;;  %v2016_v29 = vrot.slane %v2014_v3, 7  ;;  %v1577_v39 = vadd.f32 %v2627_v22, %v3557_v2  ;;  %v1569_v47 = vadd.f32 %v3557_v2, %v1568_v19  ;;  %v1735_v6 = vsel %vm3383_vm1, 0, %v1734_v34 }
 0x1e5   : > { %v2036_v36 = vor.u32 %v2034_v40, %v2033_v51  ;;  %v1732_v0 = vsel %vm3383_vm1, 0, %v1731_v12  ;;  %1736 = vst [vmem:[%s3372_s13 + $0x5c] sm:$0x1] %v1735_v6  ;;  %v1709_v48 = vsel %vm3376_vm15, 0, %v1708_v28  ;;  %v1706_v31 = vsel %vm3376_vm15, 0, %v1705_v56 }
 0x1e6   : > { %v2019_v37 = vor.u32 %v2017_v27, %v2016_v29  ;;  %v1635_v15 = vmax.f32 %v1577_v39, 0.0  ;;  %v1633_v44 = vmax.f32 %v1569_v47, 0.0  ;;  %1733 = vst [vmem:[%s3372_s13 + $0x50] sm:$0x1] %v1732_v0  ;;  %v1759_v61 = vsel %vm3383_vm1, 0, %v1758_v50 }
 0x1e7   : > { %v2244_v38 = vsel %vm3572_vm4, %v2036_v36, %v2243_v62  ;;  %1710 = vst [vmem:[%s3372_s13 + $0xb4] sm:$0x1] %v1709_v48  ;;  %1707 = vst [vmem:[%s3372_s13 + $0xa8] sm:$0x1] %v1706_v31  ;;  %v1756_v22 = vsel %vm3383_vm1, 0, %v1755_v63  ;;  %v2037_v46 = vrot.slane %v2033_v51, 4 }
 0x1e8   : > { %2245 = vst [vmem:[%s3372_s13 + $0x84] sm:$0xf] %v2244_v38  ;;  %v2237_v58 = vsel %vm3572_vm4, %v2019_v37, %v2236_v21  ;;  %v2573_v45 = vpack.c.bf16 %v1635_v15, %v1635_v15  ;;  %v2571_v41 = vpack.c.bf16 %v1633_v44, %v1633_v44  ;;  %1760 = vst [vmem:[%s3372_s13 + $0xbc] sm:$0x1] %v1759_v61  ;;  %v2020_v32 = vrot.slane %v2016_v29, 4 }
 0x1e9   : > { %2238 = vst [vmem:[%s3372_s13 + $0x78] sm:$0xf] %v2237_v58  ;;  %1757 = vst [vmem:[%s3372_s13 + $0xb0] sm:$0x1] %v1756_v22  ;;  %v2201_v56 = vld [vmem:[%s3372_s13 + $0x3c] sm:$0xf] }
 0x1ea   : > { %v2039_v16 = vshrl.u32 %v2573_v45, 16  ;;  %v2022_v1 = vshrl.u32 %v2571_v41, 16  ;;  %v2042_v25 = vshll.u32 %v2573_v45, 16  ;;  %v2025_v7 = vshll.u32 %v2571_v41, 16  ;;  %v2194_v31 = vld [vmem:[%s3372_s13 + $0x30] sm:$0xf] }
 0x1eb   : > { %v2205_v22 = vld [vmem:[%s3372_s13 + $0x44] sm:$0x1] }
 0x1ec   : > { %v2041_v8 = vrot.slane %v2039_v16, 7  ;;  %v2024_v19 = vrot.slane %v2022_v1, 7 }
 0x1ee   : > { %v2044_v49 = vor.u32 %v2042_v25, %v2041_v8  ;;  %v2046_v42 = vrot.slane %v2041_v8, 4  ;;  %v2027_v33 = vor.u32 %v2025_v7, %v2024_v19  ;;  %v2029_v20 = vrot.slane %v2024_v19, 4  ;;  %v2198_v7 = vld [vmem:[%s3372_s13 + $0x38] sm:$0x1] }
 0x1f0   : > { %v2045_v57 = vsel %vm3579_vm5, %v2037_v46, %v2044_v49  ;;  %v2248_v18 = vsel %vm3376_vm15, %v2046_v42, %v2247_v23  ;;  %v2028_v30 = vsel %vm3579_vm5, %v2020_v32, %v2027_v33  ;;  %v2241_v9 = vsel %vm3376_vm15, %v2029_v20, %v2240_v35 }
 0x1f1   : > { %2246 = vst.msk [vmem:[%s3372_s13 + $0x88] sm:$0xf] %vm2163_vm2, %v2045_v57  ;;  %2249 = vst [vmem:[%s3372_s13 + $0x8c] sm:$0x1] %v2248_v18 }
 0x1f2   : > { %2239 = vst.msk [vmem:[%s3372_s13 + $0x7c] sm:$0xf] %vm2163_vm2, %v2028_v30  ;;  %2242 = vst [vmem:[%s3372_s13 + $0x80] sm:$0x1] %v2241_v9 }
 0x213   : > { %v2614_v13 = vpop.f32.mrb[8].mxu0 }
 0x214   : > { %v1526_v24 = vadd.f32 %v2614_v13, %v3557_v2  ;;  %v1517_v53 = vpop.f32.mrb[9].mxu0  ;;  %v2257_v13 = vld [vmem:[%s3372_s13 + $0x9c] sm:$0xf] }
 0x215   : > { %v1518_v11 = vadd.f32 %v3557_v2, %v1517_v53  ;;  %v2615_v17 = vpop.f32.mrb[10].mxu0 }
 0x216   : > { %v1622_v55 = vmax.f32 %v1526_v24, 0.0  ;;  %v1529_v5 = vadd.f32 %v2615_v17, %v3557_v2  ;;  %v1520_v4 = vpop.f32.mrb[11].mxu0 }
 0x217   : > { %v1620_v59 = vmax.f32 %v1518_v11, 0.0  ;;  %v1521_v54 = vadd.f32 %v3557_v2, %v1520_v4 }
 0x218   : > { %v2560_v40 = vpack.c.bf16 %v1622_v55, %v1622_v55  ;;  %v1623_v3 = vmax.f32 %v1529_v5, 0.0  ;;  %v2250_v5 = vld [vmem:[%s3372_s13 + $0x90] sm:$0xf] }
 0x219   : > { %v2558_v34 = vpack.c.bf16 %v1620_v59, %v1620_v59  ;;  %v1621_v12 = vmax.f32 %v1521_v54, 0.0 }
 0x21a   : > { %v1929_v52 = vshrl.u32 %v2560_v40, 16  ;;  %v1932_v43 = vshll.u32 %v2560_v40, 16  ;;  %v2561_v51 = vpack.c.bf16 %v1623_v3, %v1623_v3  ;;  %v2630_v62 = vpop.f32.mrb[8].mxu1 }
 0x21b   : > { %v1912_v27 = vshrl.u32 %v2558_v34, 16  ;;  %v1915_v28 = vshll.u32 %v2558_v34, 16  ;;  %v2559_v29 = vpack.c.bf16 %v1621_v12, %v1621_v12  ;;  %v1590_v39 = vadd.f32 %v2630_v62, %v3557_v2  ;;  %v1581_v47 = vpop.f32.mrb[9].mxu1 }
 0x21c   : > { %v1931_v14 = vrot.slane %v1929_v52, 7  ;;  %v1937_v50 = vshrl.u32 %v2561_v51, 16  ;;  %v1940_v36 = vshll.u32 %v2561_v51, 16  ;;  %v1582_v21 = vadd.f32 %v3557_v2, %v1581_v47  ;;  %v2631_v6 = vpop.f32.mrb[10].mxu1  ;;  %v2261_v47 = vld [vmem:[%s3372_s13 + $0xa4] sm:$0x1] }
 0x21d   : > { %v1914_v0 = vrot.slane %v1912_v27, 7  ;;  %v1920_v63 = vshrl.u32 %v2559_v29, 16  ;;  %v1923_v37 = vshll.u32 %v2559_v29, 16  ;;  %v1638_v15 = vmax.f32 %v1590_v39, 0.0  ;;  %v1584_v44 = vpop.f32.mrb[11].mxu1 }
 0x21e   : > { %v1934_v38 = vor.u32 %v1932_v43, %v1931_v14  ;;  %v1935_v48 = vrot.slane %v1931_v14, 4  ;;  %v1939_v61 = vrot.slane %v1937_v50, 7  ;;  %v1636_v58 = vmax.f32 %v1582_v21, 0.0  ;;  %v2254_v14 = vld [vmem:[%s3372_s13 + $0x98] sm:$0x1] }
 0x21f   : > { %v1917_v45 = vor.u32 %v1915_v28, %v1914_v0  ;;  %v1918_v41 = vrot.slane %v1914_v0, 4  ;;  %v1922_v16 = vrot.slane %v1920_v63, 7  ;;  %v2576_v1 = vpack.c.bf16 %v1638_v15, %v1638_v15 }
 0x220   : > { %v2202_v8 = vsel %vm3572_vm4, %v1934_v38, %v2201_v56  ;;  %v1942_v25 = vor.u32 %v1940_v36, %v1939_v61  ;;  %v1944_v19 = vrot.slane %v1939_v61, 4  ;;  %v2574_v46 = vpack.c.bf16 %v1636_v58, %v1636_v58 }
 0x221   : > { %2203 = vst [vmem:[%s3372_s13 + $0x3c] sm:$0xf] %v2202_v8  ;;  %v2195_v32 = vsel %vm3572_vm4, %v1917_v45, %v2194_v31  ;;  %v1925_v23 = vor.u32 %v1923_v37, %v1922_v16  ;;  %v1927_v35 = vrot.slane %v1922_v16, 4  ;;  %v2065_v49 = vshrl.u32 %v2576_v1, 16 }
 0x222   : > { %2196 = vst [vmem:[%s3372_s13 + $0x30] sm:$0xf] %v2195_v32  ;;  %v1943_v42 = vsel %vm3579_vm5, %v1935_v48, %v1942_v25  ;;  %v2206_v33 = vsel %vm3376_vm15, %v1944_v19, %v2205_v22  ;;  %v2048_v20 = vshrl.u32 %v2574_v46, 16  ;;  %v2068_v9 = vshll.u32 %v2576_v1, 16 }
 0x223   : > { %2204 = vst.msk [vmem:[%s3372_s13 + $0x40] sm:$0xf] %vm2163_vm2, %v1943_v42  ;;  %2207 = vst [vmem:[%s3372_s13 + $0x44] sm:$0x1] %v2206_v33  ;;  %v1926_v57 = vsel %vm3579_vm5, %v1918_v41, %v1925_v23  ;;  %v2199_v18 = vsel %vm3376_vm15, %v1927_v35, %v2198_v7  ;;  %v2067_v30 = vrot.slane %v2065_v49, 7  ;;  %v2051_v53 = vshll.u32 %v2574_v46, 16 }
 0x224   : > { %2197 = vst.msk [vmem:[%s3372_s13 + $0x34] sm:$0xf] %vm2163_vm2, %v1926_v57  ;;  %2200 = vst [vmem:[%s3372_s13 + $0x38] sm:$0x1] %v2199_v18  ;;  %v2050_v24 = vrot.slane %v2048_v20, 7  ;;  %v1593_v11 = vadd.f32 %v2631_v6, %v3557_v2  ;;  %v1585_v17 = vadd.f32 %v3557_v2, %v1584_v44 }
 0x225   : > { %v2070_v55 = vor.u32 %v2068_v9, %v2067_v30  ;;  %v2071_v29 = vrot.slane %v2067_v30, 4  ;;  %v2215_v57 = vld [vmem:[%s3372_s13 + $0x54] sm:$0xf] }
 0x226   : > { %v2053_v4 = vor.u32 %v2051_v53, %v2050_v24  ;;  %v1639_v59 = vmax.f32 %v1593_v11, 0.0  ;;  %v1637_v54 = vmax.f32 %v1585_v17, 0.0  ;;  %v2054_v39 = vrot.slane %v2050_v24, 4 }
 0x227   : > { %v2258_v40 = vsel %vm3572_vm4, %v2070_v55, %v2257_v13 }
 0x228   : > { %2259 = vst [vmem:[%s3372_s13 + $0x9c] sm:$0xf] %v2258_v40  ;;  %v2251_v3 = vsel %vm3572_vm4, %v2053_v4, %v2250_v5  ;;  %v2577_v34 = vpack.c.bf16 %v1639_v59, %v1639_v59  ;;  %v2575_v12 = vpack.c.bf16 %v1637_v54, %v1637_v54  ;;  %v2208_v59 = vld [vmem:[%s3372_s13 + $0x48] sm:$0xf] }
 0x229   : > { %2252 = vst [vmem:[%s3372_s13 + $0x90] sm:$0xf] %v2251_v3 }
 0x22a   : > { %v2073_v52 = vshrl.u32 %v2577_v34, 16  ;;  %v2056_v43 = vshrl.u32 %v2575_v12, 16  ;;  %v2076_v62 = vshll.u32 %v2577_v34, 16  ;;  %v2059_v28 = vshll.u32 %v2575_v12, 16  ;;  %v2219_v12 = vld [vmem:[%s3372_s13 + $0x5c] sm:$0x1] }
 0x22c   : > { %v2075_v51 = vrot.slane %v2073_v52, 7  ;;  %v2058_v27 = vrot.slane %v2056_v43, 7 }
 0x22e   : > { %v2078_v56 = vor.u32 %v2076_v62, %v2075_v51  ;;  %v2080_v50 = vrot.slane %v2075_v51, 4  ;;  %v2061_v36 = vor.u32 %v2059_v28, %v2058_v27  ;;  %v2063_v21 = vrot.slane %v2058_v27, 4  ;;  %v2212_v28 = vld [vmem:[%s3372_s13 + $0x50] sm:$0x1] }
 0x230   : > { %v2079_v6 = vsel %vm3579_vm5, %v2071_v29, %v2078_v56  ;;  %v2262_v0 = vsel %vm3376_vm15, %v2080_v50, %v2261_v47  ;;  %v2062_v63 = vsel %vm3579_vm5, %v2054_v39, %v2061_v36  ;;  %v2255_v37 = vsel %vm3376_vm15, %v2063_v21, %v2254_v14 }
 0x231   : > { %2260 = vst.msk [vmem:[%s3372_s13 + $0xa0] sm:$0xf] %vm2163_vm2, %v2079_v6  ;;  %2263 = vst [vmem:[%s3372_s13 + $0xa4] sm:$0x1] %v2262_v0 }
 0x232   : > { %2253 = vst.msk [vmem:[%s3372_s13 + $0x94] sm:$0xf] %vm2163_vm2, %v2062_v63  ;;  %2256 = vst [vmem:[%s3372_s13 + $0x98] sm:$0x1] %v2255_v37 }
 0x24f   : > { %v2618_v15 = vpop.f32.mrb[12].mxu0 }
 0x250   : > { %v1542_v44 = vadd.f32 %v2618_v15, %v3557_v2  ;;  %v1533_v38 = vpop.f32.mrb[13].mxu0  ;;  %v2271_v15 = vld [vmem:[%s3372_s13 + $0xb4] sm:$0xf] }
 0x251   : > { %v1534_v48 = vadd.f32 %v3557_v2, %v1533_v38  ;;  %v2619_v31 = vpop.f32.mrb[14].mxu0 }
 0x252   : > { %v1626_v61 = vmax.f32 %v1542_v44, 0.0  ;;  %v1545_v58 = vadd.f32 %v2619_v31, %v3557_v2  ;;  %v1536_v45 = vpop.f32.mrb[15].mxu0 }
 0x253   : > { %v1624_v41 = vmax.f32 %v1534_v48, 0.0  ;;  %v1537_v22 = vadd.f32 %v3557_v2, %v1536_v45 }
 0x254   : > { %v2564_v16 = vpack.c.bf16 %v1626_v61, %v1626_v61  ;;  %v1627_v1 = vmax.f32 %v1545_v58, 0.0  ;;  %v2264_v58 = vld [vmem:[%s3372_s13 + $0xa8] sm:$0xf] }
 0x255   : > { %v2562_v8 = vpack.c.bf16 %v1624_v41, %v1624_v41  ;;  %v1625_v25 = vmax.f32 %v1537_v22, 0.0 }
 0x256   : > { %v1963_v19 = vshrl.u32 %v2564_v16, 16  ;;  %v1966_v7 = vshll.u32 %v2564_v16, 16  ;;  %v2565_v46 = vpack.c.bf16 %v1627_v1, %v1627_v1  ;;  %v2634_v32 = vpop.f32.mrb[12].mxu1 }
 0x257   : > { %v1946_v23 = vshrl.u32 %v2562_v8, 16  ;;  %v1949_v35 = vshll.u32 %v2562_v8, 16  ;;  %v2563_v49 = vpack.c.bf16 %v1625_v25, %v1625_v25  ;;  %v1606_v42 = vadd.f32 %v2634_v32, %v3557_v2  ;;  %v1597_v33 = vpop.f32.mrb[13].mxu1 }
 0x258   : > { %v1965_v20 = vrot.slane %v1963_v19, 7  ;;  %v1971_v18 = vshrl.u32 %v2565_v46, 16  ;;  %v1974_v30 = vshll.u32 %v2565_v46, 16  ;;  %v1598_v9 = vadd.f32 %v3557_v2, %v1597_v33  ;;  %v2635_v13 = vpop.f32.mrb[14].mxu1  ;;  %v2268_v33 = vld [vmem:[%s3372_s13 + $0xb0] sm:$0x1] }
 0x259   : > { %v1948_v24 = vrot.slane %v1946_v23, 7  ;;  %v1954_v53 = vshrl.u32 %v2563_v49, 16  ;;  %v1957_v11 = vshll.u32 %v2563_v49, 16  ;;  %v1642_v17 = vmax.f32 %v1606_v42, 0.0  ;;  %v1600_v55 = vpop.f32.mrb[15].mxu1 }
 0x25a   : > { %v1968_v5 = vor.u32 %v1966_v7, %v1965_v20  ;;  %v1969_v4 = vrot.slane %v1965_v20, 4  ;;  %v1973_v54 = vrot.slane %v1971_v18, 7  ;;  %v1640_v40 = vmax.f32 %v1598_v9, 0.0  ;;  %v2275_v42 = vld [vmem:[%s3372_s13 + $0xbc] sm:$0x1] }
 0x25b   : > { %v1951_v3 = vor.u32 %v1949_v35, %v1948_v24  ;;  %v1952_v34 = vrot.slane %v1948_v24, 4  ;;  %v1956_v52 = vrot.slane %v1954_v53, 7  ;;  %v2580_v43 = vpack.c.bf16 %v1642_v17, %v1642_v17 }
 0x25c   : > { %v2216_v51 = vsel %vm3572_vm4, %v1968_v5, %v2215_v57  ;;  %v1976_v62 = vor.u32 %v1974_v30, %v1973_v54  ;;  %v1978_v27 = vrot.slane %v1973_v54, 4  ;;  %v2578_v29 = vpack.c.bf16 %v1640_v40, %v1640_v40 }
 0x25d   : > { %2217 = vst [vmem:[%s3372_s13 + $0x54] sm:$0xf] %v2216_v51  ;;  %v2209_v39 = vsel %vm3572_vm4, %v1951_v3, %v2208_v59  ;;  %v1959_v47 = vor.u32 %v1957_v11, %v1956_v52  ;;  %v1961_v14 = vrot.slane %v1956_v52, 4  ;;  %v2099_v56 = vshrl.u32 %v2580_v43, 16 }
 0x25e   : > { %2210 = vst [vmem:[%s3372_s13 + $0x48] sm:$0xf] %v2209_v39  ;;  %v1977_v50 = vsel %vm3579_vm5, %v1969_v4, %v1976_v62  ;;  %v2220_v36 = vsel %vm3376_vm15, %v1978_v27, %v2219_v12  ;;  %v2082_v21 = vshrl.u32 %v2578_v29, 16  ;;  %v2102_v37 = vshll.u32 %v2580_v43, 16 }
 0x25f   : > { %2218 = vst.msk [vmem:[%s3372_s13 + $0x58] sm:$0xf] %vm2163_vm2, %v1977_v50  ;;  %2221 = vst [vmem:[%s3372_s13 + $0x5c] sm:$0x1] %v2220_v36  ;;  %v1960_v6 = vsel %vm3579_vm5, %v1952_v34, %v1959_v47  ;;  %v2213_v0 = vsel %vm3376_vm15, %v1961_v14, %v2212_v28  ;;  %v2101_v63 = vrot.slane %v2099_v56, 7  ;;  %v2085_v38 = vshll.u32 %v2578_v29, 16 }
 0x260   : > { %2211 = vst.msk [vmem:[%s3372_s13 + $0x4c] sm:$0xf] %vm2163_vm2, %v1960_v6  ;;  %2214 = vst [vmem:[%s3372_s13 + $0x50] sm:$0x1] %v2213_v0  ;;  %v2084_v44 = vrot.slane %v2082_v21, 7  ;;  %v1609_v48 = vadd.f32 %v2635_v13, %v3557_v2  ;;  %v1601_v31 = vadd.f32 %v3557_v2, %v1600_v55 }
 0x261   : > { %v2104_v61 = vor.u32 %v2102_v37, %v2101_v63  ;;  %v2105_v35 = vrot.slane %v2101_v63, 4 }
 0x262   : > { %v2087_v45 = vor.u32 %v2085_v38, %v2084_v44  ;;  %v1643_v41 = vmax.f32 %v1609_v48, 0.0  ;;  %v1641_v22 = vmax.f32 %v1601_v31, 0.0  ;;  %v2088_v49 = vrot.slane %v2084_v44, 4 }
 0x263   : > { %v2272_v16 = vsel %vm3572_vm4, %v2104_v61, %v2271_v15 }
 0x264   : > { %2273 = vst [vmem:[%s3372_s13 + $0xb4] sm:$0xf] %v2272_v16  ;;  %v2265_v1 = vsel %vm3572_vm4, %v2087_v45, %v2264_v58  ;;  %v2581_v8 = vpack.c.bf16 %v1643_v41, %v1643_v41  ;;  %v2579_v25 = vpack.c.bf16 %v1641_v22, %v1641_v22 }
 0x265   : > { %2266 = vst [vmem:[%s3372_s13 + $0xa8] sm:$0xf] %v2265_v1 }
 0x266   : > { %v2107_v19 = vshrl.u32 %v2581_v8, 16  ;;  %v2090_v7 = vshrl.u32 %v2579_v25, 16  ;;  %v2110_v46 = vshll.u32 %v2581_v8, 16  ;;  %v2093_v23 = vshll.u32 %v2579_v25, 16 }
 0x268   : > { %v2109_v2 = vrot.slane %v2107_v19, 7  ;;  %v2092_v32 = vrot.slane %v2090_v7, 7 }
 0x26a   : > { %v2112_v20 = vor.u32 %v2110_v46, %v2109_v2  ;;  %v2114_v60 = vrot.slane %v2109_v2, 4  ;;  %v2095_v57 = vor.u32 %v2093_v23, %v2092_v32  ;;  %v2097_v18 = vrot.slane %v2092_v32, 4 }
 0x26c   : > { %v2113_v30 = vsel %vm3579_vm5, %v2105_v35, %v2112_v20  ;;  %v2276_v9 = vsel %vm3376_vm15, %v2114_v60, %v2275_v42  ;;  %v2096_v13 = vsel %vm3579_vm5, %v2088_v49, %v2095_v57  ;;  %v2269_v24 = vsel %vm3376_vm15, %v2097_v18, %v2268_v33 }
 0x26d   : > { %2274 = vst.msk [vmem:[%s3372_s13 + $0xb8] sm:$0xf] %vm2163_vm2, %v2113_v30  ;;  %2277 = vst [vmem:[%s3372_s13 + $0xbc] sm:$0x1] %v2276_v9 }
 0x26e   : > { %2267 = vst.msk [vmem:[%s3372_s13 + $0xac] sm:$0xf] %vm2163_vm2, %v2096_v13  ;;  %2270 = vst [vmem:[%s3372_s13 + $0xb0] sm:$0x1] %v2269_v24 }
 0x26f PF: > { %s15_s0 = sadd.s32 1, %s2731_s0   ;;  %s3882_s18 = smov %s2727_s19 }
 0x270   : > { %p12_p5 = scmp.ge.s32.totalorder %s15_s0, 4   ;;  %s3883_s19 = smov %s3885_s2 }
 0x272   :  { %14 = sbr.rel (!%p12_p5) target bundleno = 2 (0x2), region = 82 }

</bundles_post_ra>
